<compile_context>
chip_gen: v7x
topology: tpu7x:2x2x1
jax: 0.10.0
libtpu: 0.0.40
codegen_flags: <defaults>
</compile_context>

<pallas_src>
import functools

import jax
import jax.numpy as jnp
from jax import lax
from jax.experimental import pallas as pl
from jax.experimental.pallas import tpu as pltpu

STATE_C, STATE_H, STATE_W = 3, 21, 21
STATE_FLAT = STATE_C * STATE_H * STATE_W          # 1323
STATE_FLAT_PAD = 1408                             # 11 * 128 — lane-aligned MXU contraction
FCS1_UNITS = 512
FC2_UNITS = 256
BN_EPS = 1e-5
DEFAULT_BATCH_TILE = 256                          # per-tile f32 activations ~1.5 MB


def _nbytes(x):
    return int(x.size) * x.dtype.itemsize


def _vmem_limit(footprint_bytes):
    # Real footprint + slack; never above the cross-generation-safe 32 MiB scoped default.
    return int(min(max(footprint_bytes + (6 << 20), 8 << 20), 32 << 20))


# --------------------------- shared in-kernel helpers ---------------------------

def _bn_scale_shift(s_sum, s_sq, gamma, beta, inv_n):
    """Fold batch-stat BN into one per-feature scale/shift (single-pass stats, clamped)."""
    mean = s_sum * inv_n
    var = jnp.maximum(s_sq * inv_n - mean * mean, 0.0)    # clamp: f32 cancellation guard
    scale = gamma * lax.rsqrt(var + BN_EPS)
    shift = beta - mean * scale
    return scale, shift


def _fc2_fc3_head(xs, a, w2s, w2a, b2, w3, b3):
    """relu(fc2(concat[xs, a])) as a split matmul, then fc3 (out=1) as a VPU reduction."""
    h = (jnp.dot(xs.astype(jnp.bfloat16), w2s, preferred_element_type=jnp.float32)
         + jnp.dot(a.astype(jnp.bfloat16), w2a, preferred_element_type=jnp.float32)
         + b2)
    h = jnp.maximum(h, 0.0)
    return jnp.sum(h * w3, axis=-1, keepdims=True) + b3


# --------------------------- kernels ---------------------------

def _critic_fused_kernel(s_ref, a_ref, w1_ref, gamma_ref, beta_ref,
                         w2s_ref, w2a_ref, b2_ref, w3_ref, b3_ref, out_ref):
    """Small-batch path: whole forward in one launch (no grid)."""
    n = s_ref.shape[0]
    xs = jnp.dot(s_ref[...], w1_ref[...], preferred_element_type=jnp.float32)  # (B,512) f32
    s_sum = jnp.sum(xs, axis=0, keepdims=True)
    s_sq = jnp.sum(xs * xs, axis=0, keepdims=True)
    scale, shift = _bn_scale_shift(s_sum, s_sq, gamma_ref[...], beta_ref[...],
                                   jnp.float32(1.0 / n))
    xs = jnp.maximum(xs * scale + shift, 0.0)
    out_ref[...] = _fc2_fc3_head(xs, a_ref[...], w2s_ref[...], w2a_ref[...],
                                 b2_ref[...], w3_ref[...], b3_ref[0])


def _fc1_stats_kernel(s_ref, w1_ref, xs_ref, sum_ref, ssq_ref):
    """Batched pass 1: fc1 per batch tile + BN partial statistics (accumulator outputs)."""
    @pl.when(pl.program_id(0) == 0)
    def _():
        sum_ref[...] = jnp.zeros_like(sum_ref)
        ssq_ref[...] = jnp.zeros_like(ssq_ref)

    xs = jnp.dot(s_ref[...], w1_ref[...], preferred_element_type=jnp.float32)  # (TB,512)
    xs_ref[...] = xs
    sum_ref[...] += jnp.sum(xs, axis=0, keepdims=True)
    ssq_ref[...] += jnp.sum(xs * xs, axis=0, keepdims=True)


def _bn_head_kernel(a_ref, xs_ref, sum_ref, ssq_ref, gamma_ref, beta_ref,
                    w2s_ref, w2a_ref, b2_ref, w3_ref, b3_ref, out_ref, *, inv_n):
    """Batched pass 2: normalize + relu + fc2 + fc3 per batch tile."""
    scale, shift = _bn_scale_shift(sum_ref[...], ssq_ref[...],
                                   gamma_ref[...], beta_ref[...], inv_n)
    xs = jnp.maximum(xs_ref[...] * scale + shift, 0.0)
    out_ref[...] = _fc2_fc3_head(xs, a_ref[...], w2s_ref[...], w2a_ref[...],
                                 b2_ref[...], w3_ref[...], b3_ref[0])


# --------------------------- wrapper ---------------------------

def critic_forward(state_nchw, action, params, *, batch_tile=None):
    """Training-mode (batch-stat BN) Critic forward.

    state_nchw: (B, 3, 21, 21) f32; action: (B, A) f32 -> (B, 1) f32.
    Note: BN uses current-batch statistics (PyTorch train()); running-stat buffers are
    not updated, and inputs/weights at the matmuls are bf16 (f32 accumulation).
    """
    B = state_nchw.shape[0]
    A = action.shape[1]
    if batch_tile is None:
        batch_tile = DEFAULT_BATCH_TILE

    # Host-side glue: flatten, bf16 cast, zero-pad contraction 1323 -> 1408 (w1's zero
    # padding rows make this a no-op numerically).
    s = state_nchw.reshape(B, STATE_FLAT).astype(jnp.bfloat16)
    s = jnp.pad(s, ((0, 0), (0, STATE_FLAT_PAD - STATE_FLAT)))

    vmem = pl.BlockSpec(memory_space=pltpu.MemorySpace.VMEM)
    smem = pl.BlockSpec(memory_space=pltpu.MemorySpace.SMEM)

    if B <= batch_tile:
        # ------------- small batch: single fused launch, no grid -------------
        inputs = (s, action, params["w1"], params["gamma"], params["beta"],
                  params["w2s"], params["w2a"], params["b2"], params["w3"], params["b3"])
        in_bytes = sum(_nbytes(x) for x in inputs)
        act_bytes = B * FCS1_UNITS * 4 * 4
        flops = 2 * B * (STATE_FLAT_PAD * FCS1_UNITS
                         + (FCS1_UNITS + A) * FC2_UNITS + FC2_UNITS)
        return pl.pallas_call(
            _critic_fused_kernel,
            out_shape=jax.ShapeDtypeStruct((B, 1), jnp.float32),
            in_specs=[vmem] * 9 + [smem],            # b3 rides SMEM as a scalar
            out_specs=vmem,
            compiler_params=pltpu.CompilerParams(
                vmem_limit_bytes=_vmem_limit(in_bytes + act_bytes + B * 4)),
            cost_estimate=pl.CostEstimate(flops=flops, transcendentals=FCS1_UNITS,
                                          bytes_accessed=in_bytes + B * 4),
        )(*inputs)

    # ------------- large batch: batch grid, two-pass BN, grid-resident weights -------------
    tb = max(8, -(-int(batch_tile) // 8) * 8)        # sublane-aligned tile
    nb = -(-B // tb)
    Bp = nb * tb
    a_pad = action
    if Bp != B:
        # Zero-padded rows contribute exactly 0 to the BN sums (no fc1 bias), and the
        # statistics divide by the true B below, so they remain exact.
        s = jnp.pad(s, ((0, Bp - B), (0, 0)))
        a_pad = jnp.pad(action, ((0, Bp - B), (0, 0)))

    # ---- pass 1: fc1 + partial batch statistics ----
    w1_bytes = _nbytes(params["w1"])
    p1_foot = (w1_bytes + 2 * tb * (STATE_FLAT_PAD * 2 + FCS1_UNITS * 4)
               + 4 * FCS1_UNITS * 4 + tb * FCS1_UNITS * 4)
    xs, s_sum, s_sq = pl.pallas_call(
        _fc1_stats_kernel,
        out_shape=(jax.ShapeDtypeStruct((Bp, FCS1_UNITS), jnp.float32),
                   jax.ShapeDtypeStruct((1, FCS1_UNITS), jnp.float32),
                   jax.ShapeDtypeStruct((1, FCS1_UNITS), jnp.float32)),
        grid_spec=pltpu.PrefetchScalarGridSpec(
            num_scalar_prefetch=0,
            grid=(nb,),
            in_specs=[pl.BlockSpec((tb, STATE_FLAT_PAD), lambda i: (i, 0)),
                      pl.BlockSpec((STATE_FLAT_PAD, FCS1_UNITS), lambda i: (0, 0))],
            out_specs=(pl.BlockSpec((tb, FCS1_UNITS), lambda i: (i, 0)),
                       pl.BlockSpec((1, FCS1_UNITS), lambda i: (0, 0)),
                       pl.BlockSpec((1, FCS1_UNITS), lambda i: (0, 0)))),
        compiler_params=pltpu.CompilerParams(
            dimension_semantics=("arbitrary",),       # stats accumulator revisits its block
            vmem_limit_bytes=_vmem_limit(p1_foot)),
        cost_estimate=pl.CostEstimate(
            flops=2 * Bp * STATE_FLAT_PAD * FCS1_UNITS,
            transcendentals=0,
            bytes_accessed=Bp * STATE_FLAT_PAD * 2 + w1_bytes
                           + Bp * FCS1_UNITS * 4 + 2 * FCS1_UNITS * 4),
    )(s, params["w1"])

    # ---- pass 2: normalize + relu + fc2 + fc3 ----
    head_w_bytes = sum(_nbytes(params[k]) for k in
                       ("gamma", "beta", "w2s", "w2a", "b2", "w3", "b3"))
    p2_foot = (head_w_bytes + 2 * tb * (FCS1_UNITS * 4 + A * 4 + 4)
               + 2 * tb * FC2_UNITS * 4 + 2 * FCS1_UNITS * 4)
    kernel_b = functools.partial(_bn_head_kernel, inv_n=float(1.0 / B))
    q = pl.pallas_call(
        kernel_b,
        out_shape=jax.ShapeDtypeStruct((Bp, 1), jnp.float32),
        grid_spec=pltpu.PrefetchScalarGridSpec(
            num_scalar_prefetch=0,
            grid=(nb,),
            in_specs=[pl.BlockSpec((tb, A), lambda i: (i, 0)),
                      pl.BlockSpec((tb, FCS1_UNITS), lambda i: (i, 0)),
                      pl.BlockSpec((1, FCS1_UNITS), lambda i: (0, 0)),
                      pl.BlockSpec((1, FCS1_UNITS), lambda i: (0, 0)),
                      pl.BlockSpec((1, FCS1_UNITS), lambda i: (0, 0)),
                      pl.BlockSpec((1, FCS1_UNITS), lambda i: (0, 0)),
                      pl.BlockSpec((FCS1_UNITS, FC2_UNITS), lambda i: (0, 0)),
                      pl.BlockSpec((A, FC2_UNITS), lambda i: (0, 0)),
                      pl.BlockSpec((1, FC2_UNITS), lambda i: (0, 0)),
                      pl.BlockSpec((1, FC2_UNITS), lambda i: (0, 0)),
                      smem],
            out_specs=pl.BlockSpec((tb, 1), lambda i: (i, 0))),
        compiler_params=pltpu.CompilerParams(
            dimension_semantics=("parallel",),
            vmem_limit_bytes=_vmem_limit(p2_foot)),
        cost_estimate=pl.CostEstimate(
            flops=2 * Bp * ((FCS1_UNITS + A) * FC2_UNITS + FC2_UNITS),
            transcendentals=nb * FCS1_UNITS,
            bytes_accessed=Bp * (FCS1_UNITS * 4 + A * 4 + 4) + head_w_bytes),
    )(a_pad, xs, s_sum, s_sq, params["gamma"], params["beta"],
      params["w2s"], params["w2a"], params["b2"], params["w3"], params["b3"])

    return q[:B]


# --------------------------- params & reference ---------------------------

def init_params(key, action_size):
    """Deterministic synthetic init mirroring the PyTorch module's shapes.

    Weights stored kernel-ready: (in, out) layout, w1 zero-padded to K=1408, matmul
    weights bf16 (accumulation stays f32). b1 is kept only for the reference / a future
    eval-mode (running-stats) path — batch-stat BN cancels it exactly, so the kernel
    never reads it.
    """
    ks = jax.random.split(key, 8)

    lim1 = 1.0 / jnp.sqrt(float(FCS1_UNITS))          # hidden_init uses weight.size()[0]
    w1 = jax.random.uniform(ks[0], (STATE_FLAT, FCS1_UNITS),
                            minval=-lim1, maxval=lim1, dtype=jnp.float32)
    w1 = jnp.pad(w1, ((0, STATE_FLAT_PAD - STATE_FLAT), (0, 0))).astype(jnp.bfloat16)
    b1 = jax.random.uniform(ks[1], (1, FCS1_UNITS),
                            minval=-lim1, maxval=lim1, dtype=jnp.float32)

    gamma = jnp.ones((1, FCS1_UNITS), jnp.float32)    # BatchNorm1d init
    beta = jnp.zeros((1, FCS1_UNITS), jnp.float32)

    lim2 = 1.0 / jnp.sqrt(float(FC2_UNITS))
    w2s = jax.random.uniform(ks[2], (FCS1_UNITS, FC2_UNITS),
                             minval=-lim2, maxval=lim2,
                             dtype=jnp.float32).astype(jnp.bfloat16)
    w2a = jax.random.uniform(ks[3], (action_size, FC2_UNITS),
                             minval=-lim2, maxval=lim2,
                             dtype=jnp.float32).astype(jnp.bfloat16)
    b2 = jax.random.uniform(ks[4], (1, FC2_UNITS),
                            minval=-lim2, maxval=lim2, dtype=jnp.float32)

    w3 = jax.random.uniform(ks[5], (1, FC2_UNITS),
                            minval=-3e-3, maxval=3e-3, dtype=jnp.float32)
    b3 = jax.random.uniform(ks[6], (1,),
                            minval=-3e-3, maxval=3e-3, dtype=jnp.float32)

    return dict(w1=w1, b1=b1, gamma=gamma, beta=beta,
                w2s=w2s, w2a=w2a, b2=b2, w3=w3, b3=b3)


def critic_reference(state_nchw, action, params):
    """Pure-JAX f32 reference (keeps b1; two-pass variance). State is quantized to bf16
    exactly as the kernel input is, so the comparison isolates in-kernel numerics; the
    remaining differences (bf16 matmul inputs) are ~1e-4 absolute on q."""
    B = state_nchw.shape[0]
    s = state_nchw.reshape(B, STATE_FLAT).astype(jnp.bfloat16).astype(jnp.float32)
    w1 = params["w1"].astype(jnp.float32)[:STATE_FLAT, :]
    xs = s @ w1 + params["b1"]
    mean = jnp.mean(xs, axis=0, keepdims=True)
    var = jnp.mean((xs - mean) ** 2, axis=0, keepdims=True)
    xs = (xs - mean) * lax.rsqrt(var + BN_EPS) * params["gamma"] + params["beta"]
    xs = jnp.maximum(xs, 0.0)
    w2 = jnp.concatenate([params["w2s"].astype(jnp.float32),
                          params["w2a"].astype(jnp.float32)], axis=0)
    x = jnp.concatenate([xs, action], axis=1)
    h = jnp.maximum(x @ w2 + params["b2"], 0.0)
    return h @ params["w3"].astype(jnp.float32).T + params["b3"]


# --------------------------- demo ---------------------------

if __name__ == "__main__":
    key = jax.random.PRNGKey(0)
    k_s1, k_a1, k_params, k_s2, k_a2 = jax.random.split(key, 5)

    ACTION_SIZE = 4
    params = init_params(k_params, ACTION_SIZE)

    # Case 1: small batch -> single fused launch (no grid).
    B1 = 2
    state1 = jax.random.normal(k_s1, (B1, STATE_C, STATE_H, STATE_W), dtype=jnp.float32)
    action1 = jax.random.normal(k_a1, (B1, ACTION_SIZE), dtype=jnp.float32)
    q1 = jax.block_until_ready(critic_forward(state1, action1, params))
    r1 = critic_reference(state1, action1, params)
    assert q1.shape == (B1, 1) and bool(jnp.all(jnp.isfinite(q1)))
    assert bool(jnp.allclose(q1, r1, rtol=5e-2, atol=5e-3))

    # Case 2: batch grid (2 tiles of 8) -> two-pass BN, grid-resident weights.
    B2 = 16
    state2 = jax.random.normal(k_s2, (B2, STATE_C, STATE_H, STATE_W), dtype=jnp.float32)
    action2 = jax.random.normal(k_a2, (B2, ACTION_SIZE), dtype=jnp.float32)
    q2 = jax.block_until_ready(critic_forward(state2, action2, params, batch_tile=8))
    r2 = critic_reference(state2, action2, params)
    assert q2.shape == (B2, 1) and bool(jnp.all(jnp.isfinite(q2)))
    assert bool(jnp.allclose(q2, r2, rtol=5e-2, atol=5e-3))

    # Case 3: ragged batch (10 rows, tile 8) -> zero-padded tail tile, stats stay exact.
    q3 = jax.block_until_ready(critic_forward(state2[:10], action2[:10], params,
                                              batch_tile=8))
    r3 = critic_reference(state2[:10], action2[:10], params)
    assert q3.shape == (10, 1) and bool(jnp.all(jnp.isfinite(q3)))
    assert bool(jnp.allclose(q3, r3, rtol=5e-2, atol=5e-3))

    print("KERNEL_OK")
</pallas_src>

<mosaic_0001>
module attributes {stable_mosaic.version = 11 : i64} {
  func.func @_critic_fused_kernel(%arg0: memref<2x1408xbf16, #tpu.memory_space<vmem>>, %arg1: memref<2x4xf32, #tpu.memory_space<vmem>>, %arg2: memref<1408x512xbf16, #tpu.memory_space<vmem>>, %arg3: memref<1x512xf32, #tpu.memory_space<vmem>>, %arg4: memref<1x512xf32, #tpu.memory_space<vmem>>, %arg5: memref<512x256xbf16, #tpu.memory_space<vmem>>, %arg6: memref<4x256xbf16, #tpu.memory_space<vmem>>, %arg7: memref<1x256xf32, #tpu.memory_space<vmem>>, %arg8: memref<1x256xf32, #tpu.memory_space<vmem>>, %arg9: memref<1xf32, #tpu.memory_space<smem>>, %arg10: memref<2x1xf32, #tpu.memory_space<vmem>>) attributes {dimension_semantics = [], scalar_prefetch = 0 : i64, scratch_operands = 0 : i64, tpu.core_type = #tpu.core_type<tc>} {
    %c0 = arith.constant 0 : index
    %c0_0 = arith.constant 0 : index
    %0 = vector.load %arg0[%c0, %c0_0] : memref<2x1408xbf16, #tpu.memory_space<vmem>>, vector<2x1408xbf16>
    %c0_1 = arith.constant 0 : index
    %c0_2 = arith.constant 0 : index
    %1 = vector.load %arg2[%c0_1, %c0_2] : memref<1408x512xbf16, #tpu.memory_space<vmem>>, vector<1408x512xbf16>
    %cst = arith.constant dense<0.000000e+00> : vector<2x512xf32>
    %2 = tpu.matmul %0, %1, %cst {dimension_numbers = #tpu.dot_dimension_numbers<[1], [0], [0], [1], [0, 0, 1, 1], [], []>} : vector<2x1408xbf16>, vector<1408x512xbf16>, vector<2x512xf32> -> vector<2x512xf32>
    %cst_3 = arith.constant dense<0.000000e+00> : vector<512xf32>
    %3 = vector.multi_reduction <add>, %2, %cst_3 [0] : vector<2x512xf32> to vector<512xf32>
    %4 = vector.shape_cast %3 : vector<512xf32> to vector<1x512xf32>
    %5 = arith.mulf %2, %2 : vector<2x512xf32>
    %cst_4 = arith.constant dense<0.000000e+00> : vector<512xf32>
    %6 = vector.multi_reduction <add>, %5, %cst_4 [0] : vector<2x512xf32> to vector<512xf32>
    %7 = vector.shape_cast %6 : vector<512xf32> to vector<1x512xf32>
    %c0_5 = arith.constant 0 : index
    %c0_6 = arith.constant 0 : index
    %8 = vector.load %arg3[%c0_5, %c0_6] : memref<1x512xf32, #tpu.memory_space<vmem>>, vector<1x512xf32>
    %c0_7 = arith.constant 0 : index
    %c0_8 = arith.constant 0 : index
    %9 = vector.load %arg4[%c0_7, %c0_8] : memref<1x512xf32, #tpu.memory_space<vmem>>, vector<1x512xf32>
    %cst_9 = arith.constant 5.000000e-01 : f32
    %10 = vector.broadcast %cst_9 : f32 to vector<1x512xf32>
    %11 = arith.mulf %4, %10 : vector<1x512xf32>
    %cst_10 = arith.constant 5.000000e-01 : f32
    %12 = vector.broadcast %cst_10 : f32 to vector<1x512xf32>
    %13 = arith.mulf %7, %12 : vector<1x512xf32>
    %14 = arith.mulf %11, %11 : vector<1x512xf32>
    %15 = arith.subf %13, %14 : vector<1x512xf32>
    %cst_11 = arith.constant 0.000000e+00 : f32
    %16 = vector.broadcast %cst_11 : f32 to vector<1x512xf32>
    %17 = arith.maximumf %15, %16 : vector<1x512xf32>
    %cst_12 = arith.constant 9.99999974E-6 : f32
    %18 = vector.broadcast %cst_12 : f32 to vector<1x512xf32>
    %19 = arith.addf %17, %18 : vector<1x512xf32>
    %20 = math.rsqrt %19 : vector<1x512xf32>
    %21 = arith.mulf %8, %20 : vector<1x512xf32>
    %22 = arith.mulf %11, %21 : vector<1x512xf32>
    %23 = arith.subf %9, %22 : vector<1x512xf32>
    %24 = vector.broadcast %21 : vector<1x512xf32> to vector<2x512xf32>
    %25 = arith.mulf %2, %24 : vector<2x512xf32>
    %26 = vector.broadcast %23 : vector<1x512xf32> to vector<2x512xf32>
    %27 = arith.addf %25, %26 : vector<2x512xf32>
    %cst_13 = arith.constant 0.000000e+00 : f32
    %28 = vector.broadcast %cst_13 : f32 to vector<2x512xf32>
    %29 = arith.maximumf %27, %28 : vector<2x512xf32>
    %c0_14 = arith.constant 0 : index
    %c0_15 = arith.constant 0 : index
    %30 = vector.load %arg1[%c0_14, %c0_15] : memref<2x4xf32, #tpu.memory_space<vmem>>, vector<2x4xf32>
    %c0_16 = arith.constant 0 : index
    %c0_17 = arith.constant 0 : index
    %31 = vector.load %arg5[%c0_16, %c0_17] : memref<512x256xbf16, #tpu.memory_space<vmem>>, vector<512x256xbf16>
    %c0_18 = arith.constant 0 : index
    %c0_19 = arith.constant 0 : index
    %32 = vector.load %arg6[%c0_18, %c0_19] : memref<4x256xbf16, #tpu.memory_space<vmem>>, vector<4x256xbf16>
    %c0_20 = arith.constant 0 : index
    %c0_21 = arith.constant 0 : index
    %33 = vector.load %arg7[%c0_20, %c0_21] : memref<1x256xf32, #tpu.memory_space<vmem>>, vector<1x256xf32>
    %c0_22 = arith.constant 0 : index
    %c0_23 = arith.constant 0 : index
    %34 = vector.load %arg8[%c0_22, %c0_23] : memref<1x256xf32, #tpu.memory_space<vmem>>, vector<1x256xf32>
    %c0_24 = arith.constant 0 : index
    %35 = memref.load %arg9[%c0_24] : memref<1xf32, #tpu.memory_space<smem>>
    %36 = arith.truncf %29 : vector<2x512xf32> to vector<2x512xbf16>
    %cst_25 = arith.constant dense<0.000000e+00> : vector<2x256xf32>
    %37 = tpu.matmul %36, %31, %cst_25 {dimension_numbers = #tpu.dot_dimension_numbers<[1], [0], [0], [1], [0, 0, 1, 1], [], []>} : vector<2x512xbf16>, vector<512x256xbf16>, vector<2x256xf32> -> vector<2x256xf32>
    %38 = arith.truncf %30 : vector<2x4xf32> to vector<2x4xbf16>
    %cst_26 = arith.constant dense<0.000000e+00> : vector<2x256xf32>
    %39 = tpu.matmul %38, %32, %cst_26 {dimension_numbers = #tpu.dot_dimension_numbers<[1], [0], [0], [1], [0, 0, 1, 1], [], []>} : vector<2x4xbf16>, vector<4x256xbf16>, vector<2x256xf32> -> vector<2x256xf32>
    %40 = arith.addf %37, %39 : vector<2x256xf32>
    %41 = vector.broadcast %33 : vector<1x256xf32> to vector<2x256xf32>
    %42 = arith.addf %40, %41 : vector<2x256xf32>
    %cst_27 = arith.constant 0.000000e+00 : f32
    %43 = vector.broadcast %cst_27 : f32 to vector<2x256xf32>
    %44 = arith.maximumf %42, %43 : vector<2x256xf32>
    %45 = vector.broadcast %34 : vector<1x256xf32> to vector<2x256xf32>
    %46 = arith.mulf %44, %45 : vector<2x256xf32>
    %cst_28 = arith.constant dense<0.000000e+00> : vector<2xf32>
    %47 = vector.multi_reduction <add>, %46, %cst_28 [1] : vector<2x256xf32> to vector<2xf32>
    %48 = vector.shape_cast %47 : vector<2xf32> to vector<2x1xf32>
    %49 = vector.broadcast %35 : f32 to vector<2x1xf32>
    %50 = arith.addf %48, %49 : vector<2x1xf32>
    %c0_29 = arith.constant 0 : index
    %c0_30 = arith.constant 0 : index
    %51 = vector.load %arg10[%c0_29, %c0_30] : memref<2x1xf32, #tpu.memory_space<vmem>>, vector<2x1xf32>
    tpu.vector_store %arg10[%c0_29, %c0_30], %50 {strides = array<i32>} : memref<2x1xf32, #tpu.memory_space<vmem>>, vector<2x1xf32>,
    return
  }
}

</mosaic_0001>

<bundles_post_ra>
// kernel: tpu_custom_call.1
= control target key start
LH: loop header
LB: loop body
LE: loop exit
PB: predicated region body
PF: predicated region fallthrough
CT: control target
= control target key end

     0   :  { %16 = vsyncpa [#allocation4], 0  ;;  %s5237_s0 = inlined_call_operand.hbm [shape: bf16[2,1408], index: 0, kind: input, shape index: {}]   ;;  %s5238_s1 = inlined_call_operand.hbm [shape: f32[2,4], index: 1, kind: input, shape index: {}]   ;;  %s5239_s2 = inlined_call_operand.hbm [shape: bf16[1408,512], index: 2, kind: input, shape index: {}]   ;;  %s5240_s3 = inlined_call_operand.hbm [shape: f32[1,512], index: 3, kind: input, shape index: {}]   ;;  %s5241_s4 = inlined_call_operand.hbm [shape: f32[1,512], index: 4, kind: input, shape index: {}]   ;;  %s5242_s5 = inlined_call_operand.hbm [shape: bf16[512,256], index: 5, kind: input, shape index: {}]   ;;  %s5243_s6 = inlined_call_operand.hbm [shape: bf16[4,256], index: 6, kind: input, shape index: {}]   ;;  %s5244_s7 = inlined_call_operand.hbm [shape: f32[1,256], index: 7, kind: input, shape index: {}]   ;;  %s5245_s8 = inlined_call_operand.hbm [shape: f32[1,256], index: 8, kind: input, shape index: {}]   ;;  %s5246_s9 = inlined_call_operand.<no memory space> [shape: f32[1], index: 9, kind: input, shape index: {}]   ;;  %s5247_s10 = inlined_call_operand.vmem [shape: f32[2,1], index: 10, kind: output, shape index: {}]  }
   0x1   :  { %17 = vsyncpa [#allocation6], 0 }
   0x2   :  { %18 = vsyncpa [#allocation9], 0 }
   0x3   :  { %19 = vsyncpa [#allocation12], 0 }
   0x4   :  { %20 = vsyncpa [#allocation15], 0  ;;  %s4943_s13 = smov [#allocation5]   ;;  %s4944_s15 = smov [#allocation8]  }
   0x5   :  { %s37_s14 = sshll.u32 %s4943_s13, 4  ;;  %s59_s16 = sshll.u32 %s4944_s15, 4  ;;  %s38_s14 = int_to_ptr.vmem [resolvable:$true] %s37_s14  ;;  %s60_s16 = int_to_ptr.vmem [resolvable:$true] %s59_s16 }
   0x6   :  { %s4735_s19 = scalar_lea.hbm %s5238_s1, 32 }
   0x7   :  { %p4736_p0 = scmp.ne.s32.totalorder %s5238_s1, %s4735_s19  ;;  %p4739_p1 = scmp.lt.u32.totalorder %s4735_s19, %s5238_s1 }
   0x9   :  { %p4741_p2 = pnand %p4739_p1, %p4736_p0 }
   0xb   :  { %4744 = shalt.err (!%p4741_p2)
}
   0xc   :  { %s4745_s24 = scalar_lea.vmem %s38_s14, 32  ;;  %p4750_p4 = scmp.lt.s32.totalorder %s38_s14, %s38_s14 }
   0xd   :  { %p4746_p3 = scmp.ne.s32.totalorder %s38_s14, %s4745_s24  ;;  %p4751_p5 = scmp.lt.s32.totalorder %s4745_s24, %s4745_s24 }
   0xf   :  { %p4752_p6 = por %p4751_p5, %p4750_p4 }
  0x11   :  { %p4753_p7 = pnand %p4752_p6, %p4746_p3 }
  0x13   :  { %4756 = shalt.err (!%p4753_p7)
}
  0x14   :  { %40 = dma.hbm_to_vmem [thread:$0]  %s5238_s1, 32, %s38_s14, [#allocation6]  }
  0x15   :  { %s4757_s29 = scalar_lea.hbm %s5240_s3, 64 }
  0x16   :  { %p4758_p8 = scmp.ne.s32.totalorder %s5240_s3, %s4757_s29  ;;  %p4761_p9 = scmp.lt.u32.totalorder %s4757_s29, %s5240_s3 }
  0x18   :  { %p4763_p10 = pnand %p4761_p9, %p4758_p8 }
  0x1a   :  { %4766 = shalt.err (!%p4763_p10)
}
  0x1b   :  { %s4767_s15 = scalar_lea.vmem %s60_s16, 64  ;;  %p4772_p12 = scmp.lt.s32.totalorder %s60_s16, %s60_s16 }
  0x1c   :  { %p4768_p11 = scmp.ne.s32.totalorder %s60_s16, %s4767_s15  ;;  %p4773_p13 = scmp.lt.s32.totalorder %s4767_s15, %s4767_s15 }
  0x1e   :  { %p4774_p0 = por %p4773_p13, %p4772_p12 }
  0x20   :  { %p4775_p1 = pnand %p4774_p0, %p4768_p11 }
  0x22   :  { %4778 = shalt.err (!%p4775_p1)
}
  0x23   :  { %62 = dma.hbm_to_vmem [thread:$0]  %s5240_s3, 64, %s60_s16, [#allocation9]  }
  0x24   :  { %s4945_s17 = smov [#allocation11]   ;;  %s4779_s21 = scalar_lea.hbm %s5242_s5, 8192 }
  0x25   :  { %s78_s18 = sshll.u32 %s4945_s17, 4  ;;  %p4780_p2 = scmp.ne.s32.totalorder %s5242_s5, %s4779_s21  ;;  %s79_s18 = int_to_ptr.vmem [resolvable:$true] %s78_s18 }
  0x26   :  { %p4783_p3 = scmp.lt.u32.totalorder %s4779_s21, %s5242_s5 }
  0x28   :  { %p4785_p4 = pnand %p4783_p3, %p4780_p2 }
  0x2a   :  { %4788 = shalt.err (!%p4785_p4)
}
  0x2b   :  { %s4789_s26 = scalar_lea.vmem %s79_s18, 8192  ;;  %p4794_p6 = scmp.lt.s32.totalorder %s79_s18, %s79_s18 }
  0x2c   :  { %p4790_p5 = scmp.ne.s32.totalorder %s79_s18, %s4789_s26  ;;  %p4795_p7 = scmp.lt.s32.totalorder %s4789_s26, %s4789_s26 }
  0x2e   :  { %p4796_p8 = por %p4795_p7, %p4794_p6 }
  0x30   :  { %p4797_p9 = pnand %p4796_p8, %p4790_p5 }
  0x32   :  { %4800 = shalt.err (!%p4797_p9)
}
  0x33   :  { %s4946_s3 = smov 128   ;;  %s4947_s16 = smov 8  }
  0x34   :  { %84 = dma.hbm_to_vmem [thread:$0]  %s5242_s5, 8192, %s79_s18, [#allocation12], %s4946_s3, %s4946_s3, %s4947_s16  }
  0x35   :  { %s4948_s29 = smov [#allocation14]   ;;  %s4949_s11 = smov [#allocation3]  }
  0x36   :  { %s101_s30 = sshll.u32 %s4948_s29, 4  ;;  %s27_s12 = sshll.u32 %s4949_s11, 4  ;;  %s102_s30 = int_to_ptr.vmem [resolvable:$true] %s101_s30  ;;  %s28_s12 = int_to_ptr.vmem [resolvable:$true] %s27_s12 }
  0x37   :  { %s4801_s1 = scalar_lea.hbm %s5244_s7, 32 }
  0x38   :  { %p4802_p10 = scmp.ne.s32.totalorder %s5244_s7, %s4801_s1  ;;  %p4805_p11 = scmp.lt.u32.totalorder %s4801_s1, %s5244_s7 }
  0x3a   :  { %p4807_p12 = pnand %p4805_p11, %p4802_p10 }
  0x3c   :  { %4810 = shalt.err (!%p4807_p12)
}
  0x3d   :  { %s4811_s5 = scalar_lea.vmem %s102_s30, 32  ;;  %p4816_p0 = scmp.lt.s32.totalorder %s102_s30, %s102_s30 }
  0x3e   :  { %p4812_p13 = scmp.ne.s32.totalorder %s102_s30, %s4811_s5  ;;  %p4817_p1 = scmp.lt.s32.totalorder %s4811_s5, %s4811_s5 }
  0x40   :  { %p4818_p2 = por %p4817_p1, %p4816_p0 }
  0x42   :  { %p4819_p3 = pnand %p4818_p2, %p4812_p13 }
  0x44   :  { %4822 = shalt.err (!%p4819_p3)
}
  0x45   :  { %104 = dma.hbm_to_vmem [thread:$0]  %s5244_s7, 32, %s102_s30, [#allocation15]  }
  0x46   :  { %s4823_s24 = scalar_lea.hbm %s5237_s0, 176 }
  0x47   :  { %p4824_p4 = scmp.ne.s32.totalorder %s5237_s0, %s4823_s24  ;;  %p4827_p5 = scmp.lt.u32.totalorder %s4823_s24, %s5237_s0 }
  0x49   :  { %p4829_p6 = pnand %p4827_p5, %p4824_p4 }
  0x4b   :  { %4832 = shalt.err (!%p4829_p6)
}
  0x4c   :  { %s4833_s27 = scalar_lea.vmem %s28_s12, 176  ;;  %s4837_s28 = scalar_lea.vmem %s28_s12, 192 }
  0x4d   :  { %p4834_p7 = scmp.ne.s32.totalorder %s28_s12, %s4833_s27  ;;  %p4838_p8 = scmp.lt.s32.totalorder %s28_s12, %s28_s12 }
  0x4e   :  { %p4839_p9 = scmp.lt.s32.totalorder %s4837_s28, %s4833_s27 }
  0x50   :  { %p4840_p10 = por %p4839_p9, %p4838_p8 }
  0x52   :  { %p4841_p11 = pnand %p4840_p10, %p4834_p7 }
  0x54   :  { %4844 = shalt.err (!%p4841_p11)
}
  0x55   :  { %30 = dma.hbm_to_vmem [thread:$0]  %s5237_s0, 176, %s28_s12, [#allocation4]  }
  0x56   :  { %s4950_s30 = smov [#allocation7]   ;;  %s4845_s1 = scalar_lea.hbm %s5239_s2, 45056 }
  0x57   :  { %s46_s11 = sshll.u32 %s4950_s30, 4  ;;  %p4846_p12 = scmp.ne.s32.totalorder %s5239_s2, %s4845_s1  ;;  %s47_s11 = int_to_ptr.vmem [resolvable:$true] %s46_s11 }
  0x58   :  { %p4849_p13 = scmp.lt.u32.totalorder %s4845_s1, %s5239_s2 }
  0x5a   :  { %p4851_p0 = pnand %p4849_p13, %p4846_p12 }
  0x5c   :  { %4854 = shalt.err (!%p4851_p0)
}
  0x5d   :  { %s4855_s5 = scalar_lea.vmem %s47_s11, 45056  ;;  %p4860_p2 = scmp.lt.s32.totalorder %s47_s11, %s47_s11 }
  0x5e   :  { %p4856_p1 = scmp.ne.s32.totalorder %s47_s11, %s4855_s5  ;;  %p4861_p3 = scmp.lt.s32.totalorder %s4855_s5, %s4855_s5 }
  0x60   :  { %p4862_p4 = por %p4861_p3, %p4860_p2 }
  0x62   :  { %p4863_p5 = pnand %p4862_p4, %p4856_p1 }
  0x64   :  { %4866 = shalt.err (!%p4863_p5)
}
  0x65   :  { %s4951_s0 = smov 256   ;;  %s4952_s12 = smov 16  }
  0x66   :  { %52 = dma.hbm_to_vmem [thread:$0]  %s5239_s2, 45056, %s47_s11, [#allocation6], %s4951_s0, %s4951_s0, %s4952_s12  }
  0x67   :  { %s4953_s22 = smov [#allocation10]   ;;  %s4954_s24 = smov [#allocation13]  }
  0x68   :  { %s69_s23 = sshll.u32 %s4953_s22, 4  ;;  %s91_s25 = sshll.u32 %s4954_s24, 4  ;;  %s70_s23 = int_to_ptr.vmem [resolvable:$true] %s69_s23  ;;  %s92_s25 = int_to_ptr.vmem [resolvable:$true] %s91_s25 }
  0x69   :  { %s4867_s16 = scalar_lea.hbm %s5241_s4, 64 }
  0x6a   :  { %p4868_p6 = scmp.ne.s32.totalorder %s5241_s4, %s4867_s16  ;;  %p4871_p7 = scmp.lt.u32.totalorder %s4867_s16, %s5241_s4 }
  0x6c   :  { %p4873_p8 = pnand %p4871_p7, %p4868_p6 }
  0x6e   :  { %4876 = shalt.err (!%p4873_p8)
}
  0x6f   :  { %s4877_s2 = scalar_lea.vmem %s70_s23, 64  ;;  %p4882_p10 = scmp.lt.s32.totalorder %s70_s23, %s70_s23 }
  0x70   :  { %p4878_p9 = scmp.ne.s32.totalorder %s70_s23, %s4877_s2  ;;  %p4883_p11 = scmp.lt.s32.totalorder %s4877_s2, %s4877_s2 }
  0x72   :  { %p4884_p12 = por %p4883_p11, %p4882_p10 }
  0x74   :  { %p4885_p13 = pnand %p4884_p12, %p4878_p9 }
  0x76   :  { %4888 = shalt.err (!%p4885_p13)
}
  0x77   :  { %72 = dma.hbm_to_vmem [thread:$0]  %s5241_s4, 64, %s70_s23, [#allocation9]  }
  0x78   :  { %s4889_s1 = scalar_lea.hbm %s5243_s6, 64 }
  0x79   :  { %p4890_p0 = scmp.ne.s32.totalorder %s5243_s6, %s4889_s1  ;;  %p4893_p1 = scmp.lt.u32.totalorder %s4889_s1, %s5243_s6 }
  0x7b   :  { %p4895_p2 = pnand %p4893_p1, %p4890_p0 }
  0x7d   :  { %4898 = shalt.err (!%p4895_p2)
}
  0x7e   :  { %s4899_s5 = scalar_lea.vmem %s92_s25, 64  ;;  %p4904_p4 = scmp.lt.s32.totalorder %s92_s25, %s92_s25 }
  0x7f   :  { %p4900_p3 = scmp.ne.s32.totalorder %s92_s25, %s4899_s5  ;;  %p4905_p5 = scmp.lt.s32.totalorder %s4899_s5, %s4899_s5 }
  0x81   :  { %p4906_p6 = por %p4905_p5, %p4904_p4 }
  0x83   :  { %p4907_p7 = pnand %p4906_p6, %p4900_p3 }
  0x85   :  { %4910 = shalt.err (!%p4907_p7)
}
  0x86   :  { %94 = dma.hbm_to_vmem [thread:$0]  %s5243_s6, 64, %s92_s25, [#allocation12]  }
  0x87   :  { %s4955_s12 = smov [#allocation16]   ;;  %s4911_s23 = scalar_lea.hbm %s5245_s8, 32 }
  0x88   :  { %s111_s18 = sshll.u32 %s4955_s12, 4  ;;  %p4912_p8 = scmp.ne.s32.totalorder %s5245_s8, %s4911_s23  ;;  %s112_s18 = int_to_ptr.vmem [resolvable:$true] %s111_s18 }
  0x89   :  { %p4915_p9 = scmp.lt.u32.totalorder %s4911_s23, %s5245_s8 }
  0x8b   :  { %p4917_p10 = pnand %p4915_p9, %p4912_p8 }
  0x8d   :  { %4920 = shalt.err (!%p4917_p10)
}
  0x8e   :  { %s4921_s27 = scalar_lea.vmem %s112_s18, 32  ;;  %p4926_p12 = scmp.lt.s32.totalorder %s112_s18, %s112_s18 }
  0x8f   :  { %p4922_p11 = scmp.ne.s32.totalorder %s112_s18, %s4921_s27  ;;  %p4927_p13 = scmp.lt.s32.totalorder %s4921_s27, %s4921_s27 }
  0x91   :  { %p4928_p0 = por %p4927_p13, %p4926_p12 }
  0x93   :  { %p4929_p1 = pnand %p4928_p0, %p4922_p11 }
  0x95   :  { %4932 = shalt.err (!%p4929_p1)
}
  0x96   :  { %114 = dma.hbm_to_vmem [thread:$0]  %s5245_s8, 32, %s112_s18, [#allocation15]  }
  0x97   :  { %4933 = dma.done.wait [#allocation4], 176  }
  0x98   :  { %4934 = vsyncadd [#allocation4], 4294967120 }
  0x99   :  { %4935 = dma.done.wait [#allocation6], 45088  }
  0x9a   :  { %4936 = vsyncadd [#allocation6], 4294922208 }
  0x9b   :  { %4937 = dma.done.wait [#allocation9], 128  }
  0x9c   :  { %4938 = vsyncadd [#allocation9], 4294967168 }
  0x9d   :  { %4939 = dma.done.wait [#allocation12], 8256  }
  0x9e   :  { %4940 = vsyncadd [#allocation12], 4294959040 }
  0x9f   :  { %4941 = dma.done.wait [#allocation15], 64  }
  0xa0   :  { %4942 = vsyncadd [#allocation15], 4294967232  ;;  %v4102_v0 = vld [vmem:[#allocation7 + $0x4] ss:$16 sps:$4 sm:$0xff]   ;;  %v4104_v1 = vld [vmem:[#allocation7 + $0xc] ss:$16 sps:$4 sm:$0xff]   ;;  %v505_v38 = vlaneseq }
  0xa1   :  { %2344 = vmatprep.subr.bf16.mxu0 %v4102_v0  ;;  %v4106_v2 = vld [vmem:[#allocation7] ss:$16 sps:$4 sm:$0xff]   ;;  %v4107_v3 = vld [vmem:[#allocation7 + $0x8] ss:$16 sps:$4 sm:$0xff]   ;;  %2590 = vmatprep.subr.bf16.mxu1 %v4104_v1  ;;  %v4108_v4 = vld [vmem:[#allocation7 + $0x24] ss:$16 sps:$4 sm:$0xff]  }
  0xa2   :  { %2345 = vmatpush1.bf16.msra.mxu0 %v4106_v2  ;;  %2591 = vmatpush1.bf16.msra.mxu1 %v4107_v3  ;;  %v4110_v5 = vld [vmem:[#allocation7 + $0x2c] ss:$16 sps:$4 sm:$0xff]   ;;  %v4112_v6 = vld [vmem:[#allocation7 + $0x20] ss:$16 sps:$4 sm:$0xff]   ;;  %v4113_v7 = vld [vmem:[#allocation7 + $0x28] ss:$16 sps:$4 sm:$0xff]  }
  0xa3   :  { %2346 = vmatprep.subr.bf16.mxu0 %v4108_v4  ;;  %2592 = vmatprep.subr.bf16.mxu1 %v4110_v5  ;;  %v4114_v8 = vld [vmem:[#allocation7 + $0x44] ss:$16 sps:$4 sm:$0xff]   ;;  %v4116_v9 = vld [vmem:[#allocation7 + $0x4c] ss:$16 sps:$4 sm:$0xff]   ;;  %v4118_v10 = vld [vmem:[#allocation7 + $0x40] ss:$16 sps:$4 sm:$0xff]  }
  0xa4   :  { %v4119_v11 = vld [vmem:[#allocation7 + $0x48] ss:$16 sps:$4 sm:$0xff]   ;;  %v4120_v12 = vld [vmem:[#allocation7 + $0x64] ss:$16 sps:$4 sm:$0xff]   ;;  %v4122_v13 = vld [vmem:[#allocation7 + $0x6c] ss:$16 sps:$4 sm:$0xff]  }
  0xa5   :  { %v4124_v14 = vld [vmem:[#allocation7 + $0x60] ss:$16 sps:$4 sm:$0xff]   ;;  %v4125_v15 = vld [vmem:[#allocation7 + $0x68] ss:$16 sps:$4 sm:$0xff]   ;;  %v4126_v16 = vld [vmem:[#allocation7 + $0x84] ss:$16 sps:$4 sm:$0xff]  }
  0xa6   :  { %2347 = vmatpush1.bf16.msra.mxu0 %v4112_v6  ;;  %2593 = vmatpush1.bf16.msra.mxu1 %v4113_v7  ;;  %v4128_v17 = vld [vmem:[#allocation7 + $0x8c] ss:$16 sps:$4 sm:$0xff]   ;;  %v4130_v18 = vld [vmem:[#allocation7 + $0x80] ss:$16 sps:$4 sm:$0xff]   ;;  %v4131_v19 = vld [vmem:[#allocation7 + $0x88] ss:$16 sps:$4 sm:$0xff]  }
  0xa7   :  { %2348 = vmatprep.subr.bf16.mxu0 %v4114_v8  ;;  %2594 = vmatprep.subr.bf16.mxu1 %v4116_v9  ;;  %v4132_v20 = vld [vmem:[#allocation7 + $0xa4] ss:$16 sps:$4 sm:$0xff]   ;;  %v4134_v21 = vld [vmem:[#allocation7 + $0xac] ss:$16 sps:$4 sm:$0xff]   ;;  %v4136_v22 = vld [vmem:[#allocation7 + $0xa0] ss:$16 sps:$4 sm:$0xff]  }
  0xa8   :  { %v4137_v23 = vld [vmem:[#allocation7 + $0xa8] ss:$16 sps:$4 sm:$0xff]   ;;  %v4138_v24 = vld [vmem:[#allocation7 + $0xc4] ss:$16 sps:$4 sm:$0xff]   ;;  %v4140_v25 = vld [vmem:[#allocation7 + $0xcc] ss:$16 sps:$4 sm:$0xff]  }
  0xa9   :  { %v4142_v26 = vld [vmem:[#allocation7 + $0xc0] ss:$16 sps:$4 sm:$0xff]   ;;  %v4143_v27 = vld [vmem:[#allocation7 + $0xc8] ss:$16 sps:$4 sm:$0xff]   ;;  %v4144_v28 = vld [vmem:[#allocation7 + $0xe4] ss:$16 sps:$4 sm:$0xff]  }
  0xaa   :  { %2349 = vmatpush1.bf16.msra.mxu0 %v4118_v10  ;;  %2595 = vmatpush1.bf16.msra.mxu1 %v4119_v11  ;;  %v4146_v29 = vld [vmem:[#allocation7 + $0xec] ss:$16 sps:$4 sm:$0xff]   ;;  %v4148_v30 = vld [vmem:[#allocation7 + $0xe0] ss:$16 sps:$4 sm:$0xff]   ;;  %v4149_v31 = vld [vmem:[#allocation7 + $0xe8] ss:$16 sps:$4 sm:$0xff]  }
  0xab   :  { %2350 = vmatprep.subr.bf16.mxu0 %v4120_v12  ;;  %2596 = vmatprep.subr.bf16.mxu1 %v4122_v13  ;;  %v4150_v32 = vld [vmem:[#allocation7 + $0x104] ss:$16 sps:$4 sm:$0xff]   ;;  %v4152_v33 = vld [vmem:[#allocation7 + $0x10c] ss:$16 sps:$4 sm:$0xff]   ;;  %v4154_v34 = vld [vmem:[#allocation7 + $0x100] ss:$16 sps:$4 sm:$0xff]  }
  0xac   :  { %v4155_v35 = vld [vmem:[#allocation7 + $0x108] ss:$16 sps:$4 sm:$0xff]   ;;  %v4956_v36 = vmov 1966171168   ;;  %v4156_v39 = vld [vmem:[#allocation7 + $0x124] ss:$16 sps:$4 sm:$0xff]  }
  0xad   :  { %v503_v37 = vunpack.c.l.s4 %v4956_v36  ;;  %v4158_v40 = vld [vmem:[#allocation7 + $0x12c] ss:$16 sps:$4 sm:$0xff]   ;;  %v4160_v41 = vld [vmem:[#allocation7 + $0x120] ss:$16 sps:$4 sm:$0xff]   ;;  %v5121_v43 = vshrl.u32 %v505_v38, 7  ;;  %vm2836_vm0 = vcmask 1041408  }
  0xae   :  { %2351 = vmatpush1.bf16.msra.mxu0 %v4124_v14  ;;  %2597 = vmatpush1.bf16.msra.mxu1 %v4125_v15  ;;  %v4161_v44 = vld [vmem:[#allocation7 + $0x128] ss:$16 sps:$4 sm:$0xff]   ;;  %v4162_v45 = vld [vmem:[#allocation7 + $0x144] ss:$16 sps:$4 sm:$0xff]   ;;  %v4164_v46 = vld [vmem:[#allocation7 + $0x14c] ss:$16 sps:$4 sm:$0xff]  }
  0xaf   :  { %2352 = vmatprep.subr.bf16.mxu0 %v4126_v16  ;;  %2598 = vmatprep.subr.bf16.mxu1 %v4128_v17  ;;  %v504_v42 = vunpack.c.0.s8 %v503_v37  ;;  %v4166_v47 = vld [vmem:[#allocation7 + $0x140] ss:$16 sps:$4 sm:$0xff]   ;;  %v4167_v48 = vld [vmem:[#allocation7 + $0x148] ss:$16 sps:$4 sm:$0xff]   ;;  %v4168_v50 = vld [vmem:[#allocation7 + $0x164] ss:$16 sps:$4 sm:$0xff]  }
  0xb0   :  { %v4170_v51 = vld [vmem:[#allocation7 + $0x16c] ss:$16 sps:$4 sm:$0xff]   ;;  %v5126_v52 = vld [vmem:[#allocation3] sm:$0xff]  ;;  %vm3128_vm1 = vcmask 31744   ;;  %vm3616_vm2 = vcmask 1024  }
  0xb1   :  { %v5124_v49 = vsub.s32 %v504_v42, %v5121_v43  ;;  %v4172_v53 = vld [vmem:[#allocation7 + $0x160] ss:$16 sps:$4 sm:$0xff]   ;;  %v4173_v55 = vld [vmem:[#allocation7 + $0x168] ss:$16 sps:$4 sm:$0xff]   ;;  %v4174_v56 = vld [vmem:[#allocation7 + $0x184] ss:$16 sps:$4 sm:$0xff]  }
  0xb2   :  { %2353 = vmatpush1.bf16.msra.mxu0 %v4130_v18  ;;  %2599 = vmatpush1.bf16.msra.mxu1 %v4131_v19  ;;  %v4176_v57 = vld [vmem:[#allocation7 + $0x18c] ss:$16 sps:$4 sm:$0xff]   ;;  %v4178_v59 = vld [vmem:[#allocation7 + $0x180] ss:$16 sps:$4 sm:$0xff]   ;;  %v4179_v61 = vld [vmem:[#allocation7 + $0x188] ss:$16 sps:$4 sm:$0xff]  }
  0xb3   :  { %2354 = vmatprep.subr.bf16.mxu0 %v4132_v20  ;;  %2600 = vmatprep.subr.bf16.mxu1 %v4134_v21  ;;  %v508_v54 = vrot.slane %v5126_v52, %v5124_v49  ;;  %v4180_v62 = vld [vmem:[#allocation7 + $0x1a4] ss:$16 sps:$4 sm:$0xff]   ;;  %v4182_v63 = vld [vmem:[#allocation7 + $0x1ac] ss:$16 sps:$4 sm:$0xff]   ;;  %v4184_v0 = vld [vmem:[#allocation7 + $0x1a0] ss:$16 sps:$4 sm:$0xff]  }
  0xb4   :  { %v4185_v1 = vld [vmem:[#allocation7 + $0x1a8] ss:$16 sps:$4 sm:$0xff]   ;;  %v4186_v2 = vld [vmem:[#allocation7 + $0x1c4] ss:$16 sps:$4 sm:$0xff]   ;;  %v4188_v3 = vld [vmem:[#allocation7 + $0x1cc] ss:$16 sps:$4 sm:$0xff]  }
  0xb5   :  { %v516_v58 = vcombine.high %v508_v54, %v508_v54  ;;  %v4190_v4 = vld [vmem:[#allocation7 + $0x1c0] ss:$16 sps:$4 sm:$0xff]   ;;  %v4191_v5 = vld [vmem:[#allocation7 + $0x1c8] ss:$16 sps:$4 sm:$0xff]   ;;  %v4192_v6 = vld [vmem:[#allocation7 + $0x1e4] ss:$16 sps:$4 sm:$0xff]   ;;  %v5132_v13 = vrot.slane %v508_v54, %v5124_v49 }
  0xb6   :  { %2355 = vmatpush1.bf16.msra.mxu0 %v4136_v22  ;;  %2601 = vmatpush1.bf16.msra.mxu1 %v4137_v23  ;;  %v4194_v7 = vld [vmem:[#allocation7 + $0x1ec] ss:$16 sps:$4 sm:$0xff]   ;;  %v4196_v8 = vld [vmem:[#allocation7 + $0x1e0] ss:$16 sps:$4 sm:$0xff]   ;;  %v4197_v9 = vld [vmem:[#allocation7 + $0x1e8] ss:$16 sps:$4 sm:$0xff]  }
  0xb7   :  { %2356 = vmatprep.subr.bf16.mxu0 %v4138_v24  ;;  %2602 = vmatprep.subr.bf16.mxu1 %v4140_v25  ;;  %v538_v60 = vrot.slane %v516_v58, %v5124_v49  ;;  %v4200_v10 = vld [vmem:[#allocation7 + $0x204] ss:$16 sps:$4 sm:$0xff]   ;;  %v4203_v11 = vld [vmem:[#allocation7 + $0x20c] ss:$16 sps:$4 sm:$0xff]   ;;  %v4198_v12 = vld [vmem:[#allocation7 + $0x200] ss:$16 sps:$4 sm:$0xff]  }
  0xb8   :  { %v4201_v14 = vld [vmem:[#allocation7 + $0x208] ss:$16 sps:$4 sm:$0xff]   ;;  %v4206_v15 = vld [vmem:[#allocation7 + $0x224] ss:$16 sps:$4 sm:$0xff]   ;;  %v4209_v16 = vld [vmem:[#allocation7 + $0x22c] ss:$16 sps:$4 sm:$0xff]  }
  0xb9   :  { %2376 = vmatprep.mubr.bf16.mxu0 %v538_v60  ;;  %2622 = vmatprep.mubr.bf16.mxu1 %v538_v60  ;;  %v548_v17 = vcombine.high %v538_v60, %v538_v60  ;;  %v4204_v18 = vld [vmem:[#allocation7 + $0x220] ss:$16 sps:$4 sm:$0xff]   ;;  %v4207_v19 = vld [vmem:[#allocation7 + $0x228] ss:$16 sps:$4 sm:$0xff]   ;;  %v4212_v20 = vld [vmem:[#allocation7 + $0x244] ss:$16 sps:$4 sm:$0xff]  }
  0xba   :  { %2357 = vmatpush1.bf16.msra.mxu0 %v4142_v26  ;;  %2603 = vmatpush1.bf16.msra.mxu1 %v4143_v27  ;;  %v4215_v21 = vld [vmem:[#allocation7 + $0x24c] ss:$16 sps:$4 sm:$0xff]   ;;  %v4210_v22 = vld [vmem:[#allocation7 + $0x240] ss:$16 sps:$4 sm:$0xff]   ;;  %v4213_v23 = vld [vmem:[#allocation7 + $0x248] ss:$16 sps:$4 sm:$0xff]  }
  0xbb   :  { %2358 = vmatprep.subr.bf16.mxu0 %v4144_v28  ;;  %2604 = vmatprep.subr.bf16.mxu1 %v4146_v29  ;;  %v4218_v24 = vld [vmem:[#allocation7 + $0x264] ss:$16 sps:$4 sm:$0xff]   ;;  %v4221_v25 = vld [vmem:[#allocation7 + $0x26c] ss:$16 sps:$4 sm:$0xff]   ;;  %v4216_v26 = vld [vmem:[#allocation7 + $0x260] ss:$16 sps:$4 sm:$0xff]  }
  0xbc   :  { %v4219_v27 = vld [vmem:[#allocation7 + $0x268] ss:$16 sps:$4 sm:$0xff]   ;;  %v4224_v28 = vld [vmem:[#allocation7 + $0x284] ss:$16 sps:$4 sm:$0xff]   ;;  %v4227_v29 = vld [vmem:[#allocation7 + $0x28c] ss:$16 sps:$4 sm:$0xff]  }
  0xbd   :  { %v4236_v36 = vld [vmem:[#allocation7 + $0x2c4] ss:$16 sps:$4 sm:$0xff]   ;;  %v4239_v37 = vld [vmem:[#allocation7 + $0x2cc] ss:$16 sps:$4 sm:$0xff]   ;;  %v4234_v38 = vld [vmem:[#allocation7 + $0x2c0] ss:$16 sps:$4 sm:$0xff]  }
  0xbe   :  { %2359 = vmatpush1.bf16.msra.mxu0 %v4148_v30  ;;  %2605 = vmatpush1.bf16.msra.mxu1 %v4149_v31  ;;  %v4222_v30 = vld [vmem:[#allocation7 + $0x280] ss:$16 sps:$4 sm:$0xff]   ;;  %v4225_v31 = vld [vmem:[#allocation7 + $0x288] ss:$16 sps:$4 sm:$0xff]   ;;  %v4269_v60 = vld [vmem:[#allocation7 + $0x36c] ss:$16 sps:$4 sm:$0xff]  }
  0xbf   :  { %2360 = vmatprep.subr.bf16.mxu0 %v4150_v32  ;;  %2606 = vmatprep.subr.bf16.mxu1 %v4152_v33  ;;  %v4230_v32 = vld [vmem:[#allocation7 + $0x2a4] ss:$16 sps:$4 sm:$0xff]   ;;  %v4233_v33 = vld [vmem:[#allocation7 + $0x2ac] ss:$16 sps:$4 sm:$0xff]   ;;  %v4240_v42 = vld [vmem:[#allocation7 + $0x2e0] ss:$16 sps:$4 sm:$0xff]  }
  0xc0   :  { %v4255_v54 = vld [vmem:[#allocation7 + $0x328] ss:$16 sps:$4 sm:$0xff]  }
  0xc1   :  { %v4261_v58 = vld [vmem:[#allocation7 + $0x348] ss:$16 sps:$4 sm:$0xff]  }
  0xc2   :  { %2361 = vmatpush1.bf16.msra.mxu0 %v4154_v34  ;;  %2607 = vmatpush1.bf16.msra.mxu1 %v4155_v35  ;;  %v4228_v34 = vld [vmem:[#allocation7 + $0x2a0] ss:$16 sps:$4 sm:$0xff]   ;;  %v4231_v35 = vld [vmem:[#allocation7 + $0x2a8] ss:$16 sps:$4 sm:$0xff]  }
  0xc3   :  { %2362 = vmatprep.subr.bf16.mxu0 %v4156_v39  ;;  %2608 = vmatprep.subr.bf16.mxu1 %v4158_v40  ;;  %v4237_v39 = vld [vmem:[#allocation7 + $0x2c8] ss:$16 sps:$4 sm:$0xff]   ;;  %v4242_v40 = vld [vmem:[#allocation7 + $0x2e4] ss:$16 sps:$4 sm:$0xff]  }
  0xc6   :  { %2363 = vmatpush1.bf16.msra.mxu0 %v4160_v41  ;;  %2609 = vmatpush1.bf16.msra.mxu1 %v4161_v44  ;;  %v4245_v41 = vld [vmem:[#allocation7 + $0x2ec] ss:$16 sps:$4 sm:$0xff]   ;;  %v4243_v44 = vld [vmem:[#allocation7 + $0x2e8] ss:$16 sps:$4 sm:$0xff]  }
  0xc7   :  { %2364 = vmatprep.subr.bf16.mxu0 %v4162_v45  ;;  %2610 = vmatprep.subr.bf16.mxu1 %v4164_v46  ;;  %v4248_v45 = vld [vmem:[#allocation7 + $0x304] ss:$16 sps:$4 sm:$0xff]   ;;  %v4251_v46 = vld [vmem:[#allocation7 + $0x30c] ss:$16 sps:$4 sm:$0xff]  }
  0xca   :  { %2365 = vmatpush1.bf16.msra.mxu0 %v4166_v47  ;;  %2611 = vmatpush1.bf16.msra.mxu1 %v4167_v48  ;;  %v4246_v47 = vld [vmem:[#allocation7 + $0x300] ss:$16 sps:$4 sm:$0xff]   ;;  %v4249_v48 = vld [vmem:[#allocation7 + $0x308] ss:$16 sps:$4 sm:$0xff]  }
  0xcb   :  { %2366 = vmatprep.subr.bf16.mxu0 %v4168_v50  ;;  %2612 = vmatprep.subr.bf16.mxu1 %v4170_v51  ;;  %v4254_v50 = vld [vmem:[#allocation7 + $0x324] ss:$16 sps:$4 sm:$0xff]   ;;  %v4257_v51 = vld [vmem:[#allocation7 + $0x32c] ss:$16 sps:$4 sm:$0xff]  }
  0xce   :  { %2367 = vmatpush1.bf16.msra.mxu0 %v4172_v53  ;;  %2613 = vmatpush1.bf16.msra.mxu1 %v4173_v55  ;;  %v4252_v53 = vld [vmem:[#allocation7 + $0x320] ss:$16 sps:$4 sm:$0xff]   ;;  %v4260_v55 = vld [vmem:[#allocation7 + $0x344] ss:$16 sps:$4 sm:$0xff]  }
  0xcf   :  { %2368 = vmatprep.subr.bf16.mxu0 %v4174_v56  ;;  %2614 = vmatprep.subr.bf16.mxu1 %v4176_v57  ;;  %v4263_v56 = vld [vmem:[#allocation7 + $0x34c] ss:$16 sps:$4 sm:$0xff]   ;;  %v4258_v57 = vld [vmem:[#allocation7 + $0x340] ss:$16 sps:$4 sm:$0xff]  }
  0xd2   :  { %2369 = vmatpush1.bf16.msra.mxu0 %v4178_v59  ;;  %2615 = vmatpush1.bf16.msra.mxu1 %v4179_v61  ;;  %v4266_v59 = vld [vmem:[#allocation7 + $0x364] ss:$16 sps:$4 sm:$0xff]   ;;  %v4264_v61 = vld [vmem:[#allocation7 + $0x360] ss:$16 sps:$4 sm:$0xff]  }
  0xd3   :  { %2370 = vmatprep.subr.bf16.mxu0 %v4180_v62  ;;  %2616 = vmatprep.subr.bf16.mxu1 %v4182_v63  ;;  %v4267_v62 = vld [vmem:[#allocation7 + $0x368] ss:$16 sps:$4 sm:$0xff]   ;;  %v4272_v63 = vld [vmem:[#allocation7 + $0x384] ss:$16 sps:$4 sm:$0xff]  }
  0xd6   :  { %2371 = vmatpush1.bf16.msra.mxu0 %v4184_v0  ;;  %2617 = vmatpush1.bf16.msra.mxu1 %v4185_v1  ;;  %v4275_v0 = vld [vmem:[#allocation7 + $0x38c] ss:$16 sps:$4 sm:$0xff]   ;;  %v4270_v1 = vld [vmem:[#allocation7 + $0x380] ss:$16 sps:$4 sm:$0xff]  }
  0xd7   :  { %2372 = vmatprep.subr.bf16.mxu0 %v4186_v2  ;;  %2618 = vmatprep.subr.bf16.mxu1 %v4188_v3  ;;  %v4273_v2 = vld [vmem:[#allocation7 + $0x388] ss:$16 sps:$4 sm:$0xff]   ;;  %v4278_v3 = vld [vmem:[#allocation7 + $0x3a4] ss:$16 sps:$4 sm:$0xff]  }
  0xda   :  { %2373 = vmatpush1.bf16.msra.mxu0 %v4190_v4  ;;  %2619 = vmatpush1.bf16.msra.mxu1 %v4191_v5  ;;  %v4281_v4 = vld [vmem:[#allocation7 + $0x3ac] ss:$16 sps:$4 sm:$0xff]   ;;  %v4276_v5 = vld [vmem:[#allocation7 + $0x3a0] ss:$16 sps:$4 sm:$0xff]  }
  0xdb   :  { %2374 = vmatprep.subr.bf16.mxu0 %v4192_v6  ;;  %2620 = vmatprep.subr.bf16.mxu1 %v4194_v7  ;;  %v4279_v6 = vld [vmem:[#allocation7 + $0x3a8] ss:$16 sps:$4 sm:$0xff]   ;;  %v4284_v7 = vld [vmem:[#allocation7 + $0x3c4] ss:$16 sps:$4 sm:$0xff]  }
  0xde   :  { %2375 = vmatpush1.bf16.msra.mxu0 %v4196_v8  ;;  %2621 = vmatpush1.bf16.msra.mxu1 %v4197_v9  ;;  %v4287_v8 = vld [vmem:[#allocation7 + $0x3cc] ss:$16 sps:$4 sm:$0xff]   ;;  %v501_v9 = vcombine.high %v5126_v52, %v5126_v52 }
  0xdf   :  { %2385 = vmatprep.subr.bf16.mxu0 %v4200_v10  ;;  %2631 = vmatprep.subr.bf16.mxu1 %v4203_v11  ;;  %v4282_v10 = vld [vmem:[#allocation7 + $0x3c0] ss:$16 sps:$4 sm:$0xff]   ;;  %v4285_v11 = vld [vmem:[#allocation7 + $0x3c8] ss:$16 sps:$4 sm:$0xff]  }
  0xe1   :  { %2377 = vmatmul.mubr.bf16.vlgmr.msra.gmra.mrb[0].mxu0 %v5132_v13  ;;  %2623 = vmatmul.mubr.bf16.vlgmr.msra.gmra.mrb[0].mxu1 %v5132_v13 }
  0xe2   :  { %2386 = vmatpush1.bf16.msra.mxu0 %v4198_v12  ;;  %2632 = vmatpush1.bf16.msra.mxu1 %v4201_v14  ;;  %v4290_v12 = vld [vmem:[#allocation7 + $0x3e4] ss:$16 sps:$4 sm:$0xff]   ;;  %v4293_v14 = vld [vmem:[#allocation7 + $0x3ec] ss:$16 sps:$4 sm:$0xff]  }
  0xe3   :  { %2387 = vmatprep.subr.bf16.mxu0 %v4206_v15  ;;  %2633 = vmatprep.subr.bf16.mxu1 %v4209_v16  ;;  %v5139_v15 = vrot.slane %v501_v9, %v5124_v49  ;;  %v4288_v16 = vld [vmem:[#allocation7 + $0x3e0] ss:$16 sps:$4 sm:$0xff]   ;;  %v4369_v9 = vld [vmem:[#allocation7 + $0x588] ss:$16 sps:$4 sm:$0xff]  }
  0xe4   :  { %2417 = vmatprep.mubr.bf16.mxu0 %v548_v17  ;;  %2663 = vmatprep.mubr.bf16.mxu1 %v548_v17  ;;  %v4291_v17 = vld [vmem:[#allocation7 + $0x3e8] ss:$16 sps:$4 sm:$0xff]  }
  0xe5   :  { %v517_v52 = vcombine.high %v5139_v15, %v5139_v15 }
  0xe6   :  { %2388 = vmatpush1.bf16.msra.mxu0 %v4204_v18  ;;  %2634 = vmatpush1.bf16.msra.mxu1 %v4207_v19  ;;  %v4296_v18 = vld [vmem:[#allocation7 + $0x404] ss:$16 sps:$4 sm:$0xff]   ;;  %v4299_v19 = vld [vmem:[#allocation7 + $0x40c] ss:$16 sps:$4 sm:$0xff]  }
  0xe7   :  { %2389 = vmatprep.subr.bf16.mxu0 %v4212_v20  ;;  %2635 = vmatprep.subr.bf16.mxu1 %v4215_v21  ;;  %v4294_v20 = vld [vmem:[#allocation7 + $0x400] ss:$16 sps:$4 sm:$0xff]   ;;  %v546_v21 = vcombine.high %v5132_v13, %v5132_v13  ;;  %v4311_v13 = vld [vmem:[#allocation7 + $0x44c] ss:$16 sps:$4 sm:$0xff]  }
  0xea   :  { %2390 = vmatpush1.bf16.msra.mxu0 %v4210_v22  ;;  %2636 = vmatpush1.bf16.msra.mxu1 %v4213_v23  ;;  %v4297_v22 = vld [vmem:[#allocation7 + $0x408] ss:$16 sps:$4 sm:$0xff]   ;;  %v4302_v23 = vld [vmem:[#allocation7 + $0x424] ss:$16 sps:$4 sm:$0xff]  }
  0xeb   :  { %2391 = vmatprep.subr.bf16.mxu0 %v4218_v24  ;;  %2637 = vmatprep.subr.bf16.mxu1 %v4221_v25  ;;  %v4305_v24 = vld [vmem:[#allocation7 + $0x42c] ss:$16 sps:$4 sm:$0xff]   ;;  %v5146_v25 = vrot.slane %v517_v52, %v5124_v49  ;;  %v4386_v52 = vld [vmem:[#allocation7 + $0x5e4] ss:$16 sps:$4 sm:$0xff]  }
  0xee   :  { %2392 = vmatpush1.bf16.msra.mxu0 %v4216_v26  ;;  %2638 = vmatpush1.bf16.msra.mxu1 %v4219_v27  ;;  %v4300_v26 = vld [vmem:[#allocation7 + $0x420] ss:$16 sps:$4 sm:$0xff]   ;;  %v4303_v27 = vld [vmem:[#allocation7 + $0x428] ss:$16 sps:$4 sm:$0xff]  }
  0xef   :  { %2393 = vmatprep.subr.bf16.mxu0 %v4224_v28  ;;  %2639 = vmatprep.subr.bf16.mxu1 %v4227_v29  ;;  %v4308_v28 = vld [vmem:[#allocation7 + $0x444] ss:$16 sps:$4 sm:$0xff]   ;;  %v4306_v29 = vld [vmem:[#allocation7 + $0x440] ss:$16 sps:$4 sm:$0xff]  }
  0xf2   :  { %2394 = vmatpush1.bf16.msra.mxu0 %v4222_v30  ;;  %2640 = vmatpush1.bf16.msra.mxu1 %v4225_v31  ;;  %v4309_v30 = vld [vmem:[#allocation7 + $0x448] ss:$16 sps:$4 sm:$0xff]   ;;  %v4314_v31 = vld [vmem:[#allocation7 + $0x464] ss:$16 sps:$4 sm:$0xff]  }
  0xf3   :  { %2395 = vmatprep.subr.bf16.mxu0 %v4230_v32  ;;  %2641 = vmatprep.subr.bf16.mxu1 %v4233_v33  ;;  %v4317_v32 = vld [vmem:[#allocation7 + $0x46c] ss:$16 sps:$4 sm:$0xff]   ;;  %v4312_v33 = vld [vmem:[#allocation7 + $0x460] ss:$16 sps:$4 sm:$0xff]  }
  0xf6   :  { %2396 = vmatpush1.bf16.msra.mxu0 %v4228_v34  ;;  %2642 = vmatpush1.bf16.msra.mxu1 %v4231_v35  ;;  %v4315_v34 = vld [vmem:[#allocation7 + $0x468] ss:$16 sps:$4 sm:$0xff]   ;;  %v4320_v35 = vld [vmem:[#allocation7 + $0x484] ss:$16 sps:$4 sm:$0xff]  }
  0xf7   :  { %2397 = vmatprep.subr.bf16.mxu0 %v4236_v36  ;;  %2643 = vmatprep.subr.bf16.mxu1 %v4239_v37  ;;  %v4323_v36 = vld [vmem:[#allocation7 + $0x48c] ss:$16 sps:$4 sm:$0xff]   ;;  %v4318_v37 = vld [vmem:[#allocation7 + $0x480] ss:$16 sps:$4 sm:$0xff]  }
  0xfa   :  { %2398 = vmatpush1.bf16.msra.mxu0 %v4234_v38  ;;  %2644 = vmatpush1.bf16.msra.mxu1 %v4237_v39  ;;  %v4321_v38 = vld [vmem:[#allocation7 + $0x488] ss:$16 sps:$4 sm:$0xff]   ;;  %v4326_v39 = vld [vmem:[#allocation7 + $0x4a4] ss:$16 sps:$4 sm:$0xff]  }
  0xfb   :  { %2399 = vmatprep.subr.bf16.mxu0 %v4242_v40  ;;  %2645 = vmatprep.subr.bf16.mxu1 %v4245_v41  ;;  %v4329_v40 = vld [vmem:[#allocation7 + $0x4ac] ss:$16 sps:$4 sm:$0xff]   ;;  %v4324_v41 = vld [vmem:[#allocation7 + $0x4a0] ss:$16 sps:$4 sm:$0xff]  }
  0xfe   :  { %2400 = vmatpush1.bf16.msra.mxu0 %v4240_v42  ;;  %2646 = vmatpush1.bf16.msra.mxu1 %v4243_v44  ;;  %v4327_v42 = vld [vmem:[#allocation7 + $0x4a8] ss:$16 sps:$4 sm:$0xff]   ;;  %v4332_v44 = vld [vmem:[#allocation7 + $0x4c4] ss:$16 sps:$4 sm:$0xff]  }
  0xff   :  { %2401 = vmatprep.subr.bf16.mxu0 %v4248_v45  ;;  %2647 = vmatprep.subr.bf16.mxu1 %v4251_v46  ;;  %v4335_v45 = vld [vmem:[#allocation7 + $0x4cc] ss:$16 sps:$4 sm:$0xff]   ;;  %v4330_v46 = vld [vmem:[#allocation7 + $0x4c0] ss:$16 sps:$4 sm:$0xff]  }
 0x102   :  { %2402 = vmatpush1.bf16.msra.mxu0 %v4246_v47  ;;  %2648 = vmatpush1.bf16.msra.mxu1 %v4249_v48  ;;  %v4333_v47 = vld [vmem:[#allocation7 + $0x4c8] ss:$16 sps:$4 sm:$0xff]   ;;  %v4338_v48 = vld [vmem:[#allocation7 + $0x4e4] ss:$16 sps:$4 sm:$0xff]  }
 0x103   :  { %2403 = vmatprep.subr.bf16.mxu0 %v4254_v50  ;;  %2649 = vmatprep.subr.bf16.mxu1 %v4257_v51  ;;  %v4341_v50 = vld [vmem:[#allocation7 + $0x4ec] ss:$16 sps:$4 sm:$0xff]   ;;  %v4336_v51 = vld [vmem:[#allocation7 + $0x4e0] ss:$16 sps:$4 sm:$0xff]  }
 0x106   :  { %2404 = vmatpush1.bf16.msra.mxu0 %v4252_v53  ;;  %2650 = vmatpush1.bf16.msra.mxu1 %v4255_v54  ;;  %v4339_v53 = vld [vmem:[#allocation7 + $0x4e8] ss:$16 sps:$4 sm:$0xff]   ;;  %v4344_v54 = vld [vmem:[#allocation7 + $0x504] ss:$16 sps:$4 sm:$0xff]  }
 0x107   :  { %2405 = vmatprep.subr.bf16.mxu0 %v4260_v55  ;;  %2651 = vmatprep.subr.bf16.mxu1 %v4263_v56  ;;  %v4347_v55 = vld [vmem:[#allocation7 + $0x50c] ss:$16 sps:$4 sm:$0xff]   ;;  %v4342_v56 = vld [vmem:[#allocation7 + $0x500] ss:$16 sps:$4 sm:$0xff]  }
 0x10a   :  { %2406 = vmatpush1.bf16.msra.mxu0 %v4258_v57  ;;  %2652 = vmatpush1.bf16.msra.mxu1 %v4261_v58  ;;  %v4345_v57 = vld [vmem:[#allocation7 + $0x508] ss:$16 sps:$4 sm:$0xff]   ;;  %v4350_v58 = vld [vmem:[#allocation7 + $0x524] ss:$16 sps:$4 sm:$0xff]  }
 0x10b   :  { %2407 = vmatprep.subr.bf16.mxu0 %v4266_v59  ;;  %2653 = vmatprep.subr.bf16.mxu1 %v4269_v60  ;;  %v4353_v59 = vld [vmem:[#allocation7 + $0x52c] ss:$16 sps:$4 sm:$0xff]   ;;  %v4348_v60 = vld [vmem:[#allocation7 + $0x520] ss:$16 sps:$4 sm:$0xff]  }
 0x10e   :  { %2408 = vmatpush1.bf16.msra.mxu0 %v4264_v61  ;;  %2654 = vmatpush1.bf16.msra.mxu1 %v4267_v62  ;;  %v4351_v61 = vld [vmem:[#allocation7 + $0x528] ss:$16 sps:$4 sm:$0xff]   ;;  %v4356_v62 = vld [vmem:[#allocation7 + $0x544] ss:$16 sps:$4 sm:$0xff]  }
 0x10f   :  { %2409 = vmatprep.subr.bf16.mxu0 %v4272_v63  ;;  %2655 = vmatprep.subr.bf16.mxu1 %v4275_v0  ;;  %v4359_v63 = vld [vmem:[#allocation7 + $0x54c] ss:$16 sps:$4 sm:$0xff]   ;;  %v4354_v0 = vld [vmem:[#allocation7 + $0x540] ss:$16 sps:$4 sm:$0xff]  }
 0x112   :  { %2410 = vmatpush1.bf16.msra.mxu0 %v4270_v1  ;;  %2656 = vmatpush1.bf16.msra.mxu1 %v4273_v2  ;;  %v4357_v1 = vld [vmem:[#allocation7 + $0x548] ss:$16 sps:$4 sm:$0xff]   ;;  %v4362_v2 = vld [vmem:[#allocation7 + $0x564] ss:$16 sps:$4 sm:$0xff]  }
 0x113   :  { %2411 = vmatprep.subr.bf16.mxu0 %v4278_v3  ;;  %2657 = vmatprep.subr.bf16.mxu1 %v4281_v4  ;;  %v4365_v3 = vld [vmem:[#allocation7 + $0x56c] ss:$16 sps:$4 sm:$0xff]   ;;  %v4360_v4 = vld [vmem:[#allocation7 + $0x560] ss:$16 sps:$4 sm:$0xff]  }
 0x116   :  { %2412 = vmatpush1.bf16.msra.mxu0 %v4276_v5  ;;  %2658 = vmatpush1.bf16.msra.mxu1 %v4279_v6  ;;  %v4363_v5 = vld [vmem:[#allocation7 + $0x568] ss:$16 sps:$4 sm:$0xff]   ;;  %v4368_v6 = vld [vmem:[#allocation7 + $0x584] ss:$16 sps:$4 sm:$0xff]  }
 0x117   :  { %2413 = vmatprep.subr.bf16.mxu0 %v4284_v7  ;;  %2659 = vmatprep.subr.bf16.mxu1 %v4287_v8  ;;  %v4371_v7 = vld [vmem:[#allocation7 + $0x58c] ss:$16 sps:$4 sm:$0xff]   ;;  %v4366_v8 = vld [vmem:[#allocation7 + $0x580] ss:$16 sps:$4 sm:$0xff]  }
 0x11a   :  { %2414 = vmatpush1.bf16.msra.mxu0 %v4282_v10  ;;  %2660 = vmatpush1.bf16.msra.mxu1 %v4285_v11  ;;  %v4374_v10 = vld [vmem:[#allocation7 + $0x5a4] ss:$16 sps:$4 sm:$0xff]   ;;  %v4377_v11 = vld [vmem:[#allocation7 + $0x5ac] ss:$16 sps:$4 sm:$0xff]  }
 0x11b   :  { %2415 = vmatprep.subr.bf16.mxu0 %v4290_v12  ;;  %2661 = vmatprep.subr.bf16.mxu1 %v4293_v14  ;;  %v4372_v12 = vld [vmem:[#allocation7 + $0x5a0] ss:$16 sps:$4 sm:$0xff]   ;;  %v4375_v14 = vld [vmem:[#allocation7 + $0x5a8] ss:$16 sps:$4 sm:$0xff]  }
 0x11e   :  { %2416 = vmatpush1.bf16.msra.mxu0 %v4288_v16  ;;  %2662 = vmatpush1.bf16.msra.mxu1 %v4291_v17  ;;  %v4380_v16 = vld [vmem:[#allocation7 + $0x5c4] ss:$16 sps:$4 sm:$0xff]   ;;  %v4383_v17 = vld [vmem:[#allocation7 + $0x5cc] ss:$16 sps:$4 sm:$0xff]  }
 0x11f   :  { %2426 = vmatprep.subr.bf16.mxu0 %v4296_v18  ;;  %2672 = vmatprep.subr.bf16.mxu1 %v4299_v19  ;;  %v4378_v18 = vld [vmem:[#allocation7 + $0x5c0] ss:$16 sps:$4 sm:$0xff]   ;;  %v4381_v19 = vld [vmem:[#allocation7 + $0x5c8] ss:$16 sps:$4 sm:$0xff]  }
 0x121   :  { %2418 = vmatmul.mubr.bf16.vlgmr.msra.gmra.mrb[0].mxu0 %v546_v21  ;;  %2664 = vmatmul.mubr.bf16.vlgmr.msra.gmra.mrb[0].mxu1 %v546_v21  ;;  %v4384_v21 = vld [vmem:[#allocation7 + $0x5e0] ss:$16 sps:$4 sm:$0xff]  }
 0x122   :  { %2427 = vmatpush1.bf16.msra.mxu0 %v4294_v20  ;;  %2673 = vmatpush1.bf16.msra.mxu1 %v4297_v22  ;;  %v4389_v20 = vld [vmem:[#allocation7 + $0x5ec] ss:$16 sps:$4 sm:$0xff]   ;;  %v4387_v22 = vld [vmem:[#allocation7 + $0x5e8] ss:$16 sps:$4 sm:$0xff]  }
 0x123   :  { %2428 = vmatprep.subr.bf16.mxu0 %v4302_v23  ;;  %2674 = vmatprep.subr.bf16.mxu1 %v4305_v24  ;;  %v4393_v23 = vld [vmem:[#allocation7 + $0x604] ss:$16 sps:$4 sm:$0xff]   ;;  %v4396_v24 = vld [vmem:[#allocation7 + $0x60c] ss:$16 sps:$4 sm:$0xff]  }
 0x124   :  { %2458 = vmatprep.mubr.bf16.mxu0 %v5146_v25  ;;  %2704 = vmatprep.mubr.bf16.mxu1 %v5146_v25 }
 0x126   :  { %2429 = vmatpush1.bf16.msra.mxu0 %v4300_v26  ;;  %2675 = vmatpush1.bf16.msra.mxu1 %v4303_v27  ;;  %v4391_v26 = vld [vmem:[#allocation7 + $0x600] ss:$16 sps:$4 sm:$0xff]   ;;  %v5152_v27 = vrot.slane %v5139_v15, %v5124_v49  ;;  %v4405_v15 = vld [vmem:[#allocation7 + $0x644] ss:$16 sps:$4 sm:$0xff]  }
 0x127   :  { %2430 = vmatprep.subr.bf16.mxu0 %v4308_v28  ;;  %2676 = vmatprep.subr.bf16.mxu1 %v4311_v13  ;;  %v4394_v28 = vld [vmem:[#allocation7 + $0x608] ss:$16 sps:$4 sm:$0xff]   ;;  %v4399_v13 = vld [vmem:[#allocation7 + $0x624] ss:$16 sps:$4 sm:$0xff]  }
 0x12a   :  { %2431 = vmatpush1.bf16.msra.mxu0 %v4306_v29  ;;  %2677 = vmatpush1.bf16.msra.mxu1 %v4309_v30  ;;  %v4402_v29 = vld [vmem:[#allocation7 + $0x62c] ss:$16 sps:$4 sm:$0xff]   ;;  %v549_v30 = vcombine.high %v5146_v25, %v5146_v25  ;;  %v4411_v25 = vld [vmem:[#allocation7 + $0x664] ss:$16 sps:$4 sm:$0xff]  }
 0x12b   :  { %2432 = vmatprep.subr.bf16.mxu0 %v4314_v31  ;;  %2678 = vmatprep.subr.bf16.mxu1 %v4317_v32  ;;  %v4397_v31 = vld [vmem:[#allocation7 + $0x620] ss:$16 sps:$4 sm:$0xff]   ;;  %v4400_v32 = vld [vmem:[#allocation7 + $0x628] ss:$16 sps:$4 sm:$0xff]  }
 0x12e   :  { %2433 = vmatpush1.bf16.msra.mxu0 %v4312_v33  ;;  %2679 = vmatpush1.bf16.msra.mxu1 %v4315_v34  ;;  %v4408_v33 = vld [vmem:[#allocation7 + $0x64c] ss:$16 sps:$4 sm:$0xff]   ;;  %v4403_v34 = vld [vmem:[#allocation7 + $0x640] ss:$16 sps:$4 sm:$0xff]  }
 0x12f   :  { %2434 = vmatprep.subr.bf16.mxu0 %v4320_v35  ;;  %2680 = vmatprep.subr.bf16.mxu1 %v4323_v36  ;;  %v4406_v35 = vld [vmem:[#allocation7 + $0x648] ss:$16 sps:$4 sm:$0xff]   ;;  %v4414_v36 = vld [vmem:[#allocation7 + $0x66c] ss:$16 sps:$4 sm:$0xff]  }
 0x132   :  { %2435 = vmatpush1.bf16.msra.mxu0 %v4318_v37  ;;  %2681 = vmatpush1.bf16.msra.mxu1 %v4321_v38  ;;  %v4409_v37 = vld [vmem:[#allocation7 + $0x660] ss:$16 sps:$4 sm:$0xff]   ;;  %v4412_v38 = vld [vmem:[#allocation7 + $0x668] ss:$16 sps:$4 sm:$0xff]  }
 0x133   :  { %2436 = vmatprep.subr.bf16.mxu0 %v4326_v39  ;;  %2682 = vmatprep.subr.bf16.mxu1 %v4329_v40  ;;  %v4417_v39 = vld [vmem:[#allocation7 + $0x684] ss:$16 sps:$4 sm:$0xff]   ;;  %v4420_v40 = vld [vmem:[#allocation7 + $0x68c] ss:$16 sps:$4 sm:$0xff]  }
 0x136   :  { %2437 = vmatpush1.bf16.msra.mxu0 %v4324_v41  ;;  %2683 = vmatpush1.bf16.msra.mxu1 %v4327_v42  ;;  %v4415_v41 = vld [vmem:[#allocation7 + $0x680] ss:$16 sps:$4 sm:$0xff]   ;;  %v4418_v42 = vld [vmem:[#allocation7 + $0x688] ss:$16 sps:$4 sm:$0xff]  }
 0x137   :  { %2438 = vmatprep.subr.bf16.mxu0 %v4332_v44  ;;  %2684 = vmatprep.subr.bf16.mxu1 %v4335_v45  ;;  %v4423_v44 = vld [vmem:[#allocation7 + $0x6a4] ss:$16 sps:$4 sm:$0xff]   ;;  %v4426_v45 = vld [vmem:[#allocation7 + $0x6ac] ss:$16 sps:$4 sm:$0xff]  }
 0x13a   :  { %2439 = vmatpush1.bf16.msra.mxu0 %v4330_v46  ;;  %2685 = vmatpush1.bf16.msra.mxu1 %v4333_v47  ;;  %v4421_v46 = vld [vmem:[#allocation7 + $0x6a0] ss:$16 sps:$4 sm:$0xff]   ;;  %v4424_v47 = vld [vmem:[#allocation7 + $0x6a8] ss:$16 sps:$4 sm:$0xff]  }
 0x13b   :  { %2440 = vmatprep.subr.bf16.mxu0 %v4338_v48  ;;  %2686 = vmatprep.subr.bf16.mxu1 %v4341_v50  ;;  %v4429_v48 = vld [vmem:[#allocation7 + $0x6c4] ss:$16 sps:$4 sm:$0xff]   ;;  %v4432_v50 = vld [vmem:[#allocation7 + $0x6cc] ss:$16 sps:$4 sm:$0xff]  }
 0x13e   :  { %2441 = vmatpush1.bf16.msra.mxu0 %v4336_v51  ;;  %2687 = vmatpush1.bf16.msra.mxu1 %v4339_v53  ;;  %v4427_v51 = vld [vmem:[#allocation7 + $0x6c0] ss:$16 sps:$4 sm:$0xff]   ;;  %v4430_v53 = vld [vmem:[#allocation7 + $0x6c8] ss:$16 sps:$4 sm:$0xff]  }
 0x13f   :  { %2442 = vmatprep.subr.bf16.mxu0 %v4344_v54  ;;  %2688 = vmatprep.subr.bf16.mxu1 %v4347_v55  ;;  %v4435_v54 = vld [vmem:[#allocation7 + $0x6e4] ss:$16 sps:$4 sm:$0xff]   ;;  %v4438_v55 = vld [vmem:[#allocation7 + $0x6ec] ss:$16 sps:$4 sm:$0xff]  }
 0x142   :  { %2443 = vmatpush1.bf16.msra.mxu0 %v4342_v56  ;;  %2689 = vmatpush1.bf16.msra.mxu1 %v4345_v57  ;;  %v4433_v56 = vld [vmem:[#allocation7 + $0x6e0] ss:$16 sps:$4 sm:$0xff]   ;;  %v4436_v57 = vld [vmem:[#allocation7 + $0x6e8] ss:$16 sps:$4 sm:$0xff]  }
 0x143   :  { %2444 = vmatprep.subr.bf16.mxu0 %v4350_v58  ;;  %2690 = vmatprep.subr.bf16.mxu1 %v4353_v59  ;;  %v4441_v58 = vld [vmem:[#allocation7 + $0x704] ss:$16 sps:$4 sm:$0xff]   ;;  %v4444_v59 = vld [vmem:[#allocation7 + $0x70c] ss:$16 sps:$4 sm:$0xff]  }
 0x146   :  { %2445 = vmatpush1.bf16.msra.mxu0 %v4348_v60  ;;  %2691 = vmatpush1.bf16.msra.mxu1 %v4351_v61  ;;  %v4439_v60 = vld [vmem:[#allocation7 + $0x700] ss:$16 sps:$4 sm:$0xff]   ;;  %v4442_v61 = vld [vmem:[#allocation7 + $0x708] ss:$16 sps:$4 sm:$0xff]  }
 0x147   :  { %2446 = vmatprep.subr.bf16.mxu0 %v4356_v62  ;;  %2692 = vmatprep.subr.bf16.mxu1 %v4359_v63  ;;  %v4447_v62 = vld [vmem:[#allocation7 + $0x724] ss:$16 sps:$4 sm:$0xff]   ;;  %v4450_v63 = vld [vmem:[#allocation7 + $0x72c] ss:$16 sps:$4 sm:$0xff]  }
 0x14a   :  { %2447 = vmatpush1.bf16.msra.mxu0 %v4354_v0  ;;  %2693 = vmatpush1.bf16.msra.mxu1 %v4357_v1  ;;  %v4445_v0 = vld [vmem:[#allocation7 + $0x720] ss:$16 sps:$4 sm:$0xff]   ;;  %v4448_v1 = vld [vmem:[#allocation7 + $0x728] ss:$16 sps:$4 sm:$0xff]  }
 0x14b   :  { %2448 = vmatprep.subr.bf16.mxu0 %v4362_v2  ;;  %2694 = vmatprep.subr.bf16.mxu1 %v4365_v3  ;;  %v4453_v2 = vld [vmem:[#allocation7 + $0x744] ss:$16 sps:$4 sm:$0xff]   ;;  %v4456_v3 = vld [vmem:[#allocation7 + $0x74c] ss:$16 sps:$4 sm:$0xff]  }
 0x14e   :  { %2449 = vmatpush1.bf16.msra.mxu0 %v4360_v4  ;;  %2695 = vmatpush1.bf16.msra.mxu1 %v4363_v5  ;;  %v4451_v4 = vld [vmem:[#allocation7 + $0x740] ss:$16 sps:$4 sm:$0xff]   ;;  %v4454_v5 = vld [vmem:[#allocation7 + $0x748] ss:$16 sps:$4 sm:$0xff]  }
 0x14f   :  { %2450 = vmatprep.subr.bf16.mxu0 %v4368_v6  ;;  %2696 = vmatprep.subr.bf16.mxu1 %v4371_v7  ;;  %v4459_v6 = vld [vmem:[#allocation7 + $0x764] ss:$16 sps:$4 sm:$0xff]   ;;  %v4462_v7 = vld [vmem:[#allocation7 + $0x76c] ss:$16 sps:$4 sm:$0xff]  }
 0x152   :  { %2451 = vmatpush1.bf16.msra.mxu0 %v4366_v8  ;;  %2697 = vmatpush1.bf16.msra.mxu1 %v4369_v9  ;;  %v4457_v8 = vld [vmem:[#allocation7 + $0x760] ss:$16 sps:$4 sm:$0xff]   ;;  %v4460_v9 = vld [vmem:[#allocation7 + $0x768] ss:$16 sps:$4 sm:$0xff]  }
 0x153   :  { %2452 = vmatprep.subr.bf16.mxu0 %v4374_v10  ;;  %2698 = vmatprep.subr.bf16.mxu1 %v4377_v11  ;;  %v4465_v10 = vld [vmem:[#allocation7 + $0x784] ss:$16 sps:$4 sm:$0xff]   ;;  %v4468_v11 = vld [vmem:[#allocation7 + $0x78c] ss:$16 sps:$4 sm:$0xff]  }
 0x156   :  { %2453 = vmatpush1.bf16.msra.mxu0 %v4372_v12  ;;  %2699 = vmatpush1.bf16.msra.mxu1 %v4375_v14  ;;  %v4463_v12 = vld [vmem:[#allocation7 + $0x780] ss:$16 sps:$4 sm:$0xff]   ;;  %v4466_v14 = vld [vmem:[#allocation7 + $0x788] ss:$16 sps:$4 sm:$0xff]  }
 0x157   :  { %2454 = vmatprep.subr.bf16.mxu0 %v4380_v16  ;;  %2700 = vmatprep.subr.bf16.mxu1 %v4383_v17  ;;  %v4471_v16 = vld [vmem:[#allocation7 + $0x7a4] ss:$16 sps:$4 sm:$0xff]   ;;  %v4474_v17 = vld [vmem:[#allocation7 + $0x7ac] ss:$16 sps:$4 sm:$0xff]  }
 0x15a   :  { %2455 = vmatpush1.bf16.msra.mxu0 %v4378_v18  ;;  %2701 = vmatpush1.bf16.msra.mxu1 %v4381_v19  ;;  %v4469_v18 = vld [vmem:[#allocation7 + $0x7a0] ss:$16 sps:$4 sm:$0xff]   ;;  %v4472_v19 = vld [vmem:[#allocation7 + $0x7a8] ss:$16 sps:$4 sm:$0xff]  }
 0x15b   :  { %2456 = vmatprep.subr.bf16.mxu0 %v4386_v52  ;;  %2702 = vmatprep.subr.bf16.mxu1 %v4389_v20  ;;  %v4477_v52 = vld [vmem:[#allocation7 + $0x7c4] ss:$16 sps:$4 sm:$0xff]   ;;  %v4480_v20 = vld [vmem:[#allocation7 + $0x7cc] ss:$16 sps:$4 sm:$0xff]  }
 0x15e   :  { %2457 = vmatpush1.bf16.msra.mxu0 %v4384_v21  ;;  %2703 = vmatpush1.bf16.msra.mxu1 %v4387_v22  ;;  %v4475_v21 = vld [vmem:[#allocation7 + $0x7c0] ss:$16 sps:$4 sm:$0xff]   ;;  %v4478_v22 = vld [vmem:[#allocation7 + $0x7c8] ss:$16 sps:$4 sm:$0xff]  }
 0x15f   :  { %2467 = vmatprep.subr.bf16.mxu0 %v4393_v23  ;;  %2713 = vmatprep.subr.bf16.mxu1 %v4396_v24  ;;  %v4483_v23 = vld [vmem:[#allocation7 + $0x7e4] ss:$16 sps:$4 sm:$0xff]   ;;  %v4486_v24 = vld [vmem:[#allocation7 + $0x7ec] ss:$16 sps:$4 sm:$0xff]  }
 0x161   :  { %2459 = vmatmul.mubr.bf16.vlgmr.msra.gmra.mrb[0].mxu0 %v5152_v27  ;;  %2705 = vmatmul.mubr.bf16.vlgmr.msra.gmra.mrb[0].mxu1 %v5152_v27 }
 0x162   :  { %2468 = vmatpush1.bf16.msra.mxu0 %v4391_v26  ;;  %2714 = vmatpush1.bf16.msra.mxu1 %v4394_v28  ;;  %v5158_v26 = vld.sshfl [vmem:[#allocation3 + $0x8] sm:$0x13 pattern:$0x75316420]  ;;  %v4481_v28 = vld [vmem:[#allocation7 + $0x7e0] ss:$16 sps:$4 sm:$0xff]  }
 0x163   :  { %2469 = vmatprep.subr.bf16.mxu0 %v4399_v13  ;;  %2715 = vmatprep.subr.bf16.mxu1 %v4402_v29  ;;  %v4484_v13 = vld [vmem:[#allocation7 + $0x7e8] ss:$16 sps:$4 sm:$0xff]   ;;  %v4489_v29 = vld [vmem:[#allocation7 + $0x804] ss:$16 sps:$4 sm:$0xff]  }
 0x164   :  { %2499 = vmatprep.mubr.bf16.mxu0 %v549_v30  ;;  %2745 = vmatprep.mubr.bf16.mxu1 %v549_v30  ;;  %v4492_v30 = vld [vmem:[#allocation7 + $0x80c] ss:$16 sps:$4 sm:$0xff]  }
 0x166   :  { %2470 = vmatpush1.bf16.msra.mxu0 %v4397_v31  ;;  %2716 = vmatpush1.bf16.msra.mxu1 %v4400_v32  ;;  %v4487_v31 = vld [vmem:[#allocation7 + $0x800] ss:$16 sps:$4 sm:$0xff]   ;;  %v4490_v32 = vld [vmem:[#allocation7 + $0x808] ss:$16 sps:$4 sm:$0xff]  }
 0x167   :  { %2471 = vmatprep.subr.bf16.mxu0 %v4405_v15  ;;  %2717 = vmatprep.subr.bf16.mxu1 %v4408_v33  ;;  %v557_v15 = vcombine.high %v5158_v26, %v5158_v26  ;;  %v547_v33 = vcombine.high %v5152_v27, %v5152_v27  ;;  %v4499_v27 = vld [vmem:[#allocation7 + $0x840] ss:$16 sps:$4 sm:$0xff]  }
 0x16a   :  { %2472 = vmatpush1.bf16.msra.mxu0 %v4403_v34  ;;  %2718 = vmatpush1.bf16.msra.mxu1 %v4406_v35  ;;  %v4495_v34 = vld [vmem:[#allocation7 + $0x824] ss:$16 sps:$4 sm:$0xff]   ;;  %v4498_v35 = vld [vmem:[#allocation7 + $0x82c] ss:$16 sps:$4 sm:$0xff]  }
 0x16b   :  { %2473 = vmatprep.subr.bf16.mxu0 %v4411_v25  ;;  %2719 = vmatprep.subr.bf16.mxu1 %v4414_v36  ;;  %v571_v25 = vrot.slane %v557_v15, %v5124_v49  ;;  %v4493_v36 = vld [vmem:[#allocation7 + $0x820] ss:$16 sps:$4 sm:$0xff]  }
 0x16c   :  { %v4577_v15 = vld [vmem:[#allocation7 + $0x9e0] ss:$16 sps:$4 sm:$0xff]  }
 0x16e   :  { %2474 = vmatpush1.bf16.msra.mxu0 %v4409_v37  ;;  %2720 = vmatpush1.bf16.msra.mxu1 %v4412_v38  ;;  %v4496_v37 = vld [vmem:[#allocation7 + $0x828] ss:$16 sps:$4 sm:$0xff]   ;;  %v4501_v38 = vld [vmem:[#allocation7 + $0x844] ss:$16 sps:$4 sm:$0xff]  }
 0x16f   :  { %2475 = vmatprep.subr.bf16.mxu0 %v4417_v39  ;;  %2721 = vmatprep.subr.bf16.mxu1 %v4420_v40  ;;  %v4504_v39 = vld [vmem:[#allocation7 + $0x84c] ss:$16 sps:$4 sm:$0xff]   ;;  %v4502_v40 = vld [vmem:[#allocation7 + $0x848] ss:$16 sps:$4 sm:$0xff]  }
 0x172   :  { %2476 = vmatpush1.bf16.msra.mxu0 %v4415_v41  ;;  %2722 = vmatpush1.bf16.msra.mxu1 %v4418_v42  ;;  %v4507_v41 = vld [vmem:[#allocation7 + $0x864] ss:$16 sps:$4 sm:$0xff]   ;;  %v4510_v42 = vld [vmem:[#allocation7 + $0x86c] ss:$16 sps:$4 sm:$0xff]  }
 0x173   :  { %2477 = vmatprep.subr.bf16.mxu0 %v4423_v44  ;;  %2723 = vmatprep.subr.bf16.mxu1 %v4426_v45  ;;  %v4505_v44 = vld [vmem:[#allocation7 + $0x860] ss:$16 sps:$4 sm:$0xff]   ;;  %v4508_v45 = vld [vmem:[#allocation7 + $0x868] ss:$16 sps:$4 sm:$0xff]  }
 0x176   :  { %2478 = vmatpush1.bf16.msra.mxu0 %v4421_v46  ;;  %2724 = vmatpush1.bf16.msra.mxu1 %v4424_v47  ;;  %v4513_v46 = vld [vmem:[#allocation7 + $0x884] ss:$16 sps:$4 sm:$0xff]   ;;  %v4516_v47 = vld [vmem:[#allocation7 + $0x88c] ss:$16 sps:$4 sm:$0xff]  }
 0x177   :  { %2479 = vmatprep.subr.bf16.mxu0 %v4429_v48  ;;  %2725 = vmatprep.subr.bf16.mxu1 %v4432_v50  ;;  %v4511_v48 = vld [vmem:[#allocation7 + $0x880] ss:$16 sps:$4 sm:$0xff]   ;;  %v4514_v50 = vld [vmem:[#allocation7 + $0x888] ss:$16 sps:$4 sm:$0xff]  }
 0x17a   :  { %2480 = vmatpush1.bf16.msra.mxu0 %v4427_v51  ;;  %2726 = vmatpush1.bf16.msra.mxu1 %v4430_v53  ;;  %v4519_v51 = vld [vmem:[#allocation7 + $0x8a4] ss:$16 sps:$4 sm:$0xff]   ;;  %v4522_v53 = vld [vmem:[#allocation7 + $0x8ac] ss:$16 sps:$4 sm:$0xff]  }
 0x17b   :  { %2481 = vmatprep.subr.bf16.mxu0 %v4435_v54  ;;  %2727 = vmatprep.subr.bf16.mxu1 %v4438_v55  ;;  %v4517_v54 = vld [vmem:[#allocation7 + $0x8a0] ss:$16 sps:$4 sm:$0xff]   ;;  %v4520_v55 = vld [vmem:[#allocation7 + $0x8a8] ss:$16 sps:$4 sm:$0xff]  }
 0x17e   :  { %2482 = vmatpush1.bf16.msra.mxu0 %v4433_v56  ;;  %2728 = vmatpush1.bf16.msra.mxu1 %v4436_v57  ;;  %v4525_v56 = vld [vmem:[#allocation7 + $0x8c4] ss:$16 sps:$4 sm:$0xff]   ;;  %v4528_v57 = vld [vmem:[#allocation7 + $0x8cc] ss:$16 sps:$4 sm:$0xff]  }
 0x17f   :  { %2483 = vmatprep.subr.bf16.mxu0 %v4441_v58  ;;  %2729 = vmatprep.subr.bf16.mxu1 %v4444_v59  ;;  %v4523_v58 = vld [vmem:[#allocation7 + $0x8c0] ss:$16 sps:$4 sm:$0xff]   ;;  %v4526_v59 = vld [vmem:[#allocation7 + $0x8c8] ss:$16 sps:$4 sm:$0xff]  }
 0x182   :  { %2484 = vmatpush1.bf16.msra.mxu0 %v4439_v60  ;;  %2730 = vmatpush1.bf16.msra.mxu1 %v4442_v61  ;;  %v4531_v60 = vld [vmem:[#allocation7 + $0x8e4] ss:$16 sps:$4 sm:$0xff]   ;;  %v4534_v61 = vld [vmem:[#allocation7 + $0x8ec] ss:$16 sps:$4 sm:$0xff]  }
 0x183   :  { %2485 = vmatprep.subr.bf16.mxu0 %v4447_v62  ;;  %2731 = vmatprep.subr.bf16.mxu1 %v4450_v63  ;;  %v4529_v62 = vld [vmem:[#allocation7 + $0x8e0] ss:$16 sps:$4 sm:$0xff]   ;;  %v4532_v63 = vld [vmem:[#allocation7 + $0x8e8] ss:$16 sps:$4 sm:$0xff]  }
 0x186   :  { %2486 = vmatpush1.bf16.msra.mxu0 %v4445_v0  ;;  %2732 = vmatpush1.bf16.msra.mxu1 %v4448_v1  ;;  %v4537_v0 = vld [vmem:[#allocation7 + $0x904] ss:$16 sps:$4 sm:$0xff]   ;;  %v4540_v1 = vld [vmem:[#allocation7 + $0x90c] ss:$16 sps:$4 sm:$0xff]  }
 0x187   :  { %2487 = vmatprep.subr.bf16.mxu0 %v4453_v2  ;;  %2733 = vmatprep.subr.bf16.mxu1 %v4456_v3  ;;  %v4535_v2 = vld [vmem:[#allocation7 + $0x900] ss:$16 sps:$4 sm:$0xff]   ;;  %v4538_v3 = vld [vmem:[#allocation7 + $0x908] ss:$16 sps:$4 sm:$0xff]  }
 0x18a   :  { %2488 = vmatpush1.bf16.msra.mxu0 %v4451_v4  ;;  %2734 = vmatpush1.bf16.msra.mxu1 %v4454_v5  ;;  %v4543_v4 = vld [vmem:[#allocation7 + $0x924] ss:$16 sps:$4 sm:$0xff]   ;;  %v4546_v5 = vld [vmem:[#allocation7 + $0x92c] ss:$16 sps:$4 sm:$0xff]  }
 0x18b   :  { %2489 = vmatprep.subr.bf16.mxu0 %v4459_v6  ;;  %2735 = vmatprep.subr.bf16.mxu1 %v4462_v7  ;;  %v4541_v6 = vld [vmem:[#allocation7 + $0x920] ss:$16 sps:$4 sm:$0xff]   ;;  %v4544_v7 = vld [vmem:[#allocation7 + $0x928] ss:$16 sps:$4 sm:$0xff]  }
 0x18e   :  { %2490 = vmatpush1.bf16.msra.mxu0 %v4457_v8  ;;  %2736 = vmatpush1.bf16.msra.mxu1 %v4460_v9  ;;  %v4549_v8 = vld [vmem:[#allocation7 + $0x944] ss:$16 sps:$4 sm:$0xff]   ;;  %v4552_v9 = vld [vmem:[#allocation7 + $0x94c] ss:$16 sps:$4 sm:$0xff]  }
 0x18f   :  { %2491 = vmatprep.subr.bf16.mxu0 %v4465_v10  ;;  %2737 = vmatprep.subr.bf16.mxu1 %v4468_v11  ;;  %v4547_v10 = vld [vmem:[#allocation7 + $0x940] ss:$16 sps:$4 sm:$0xff]   ;;  %v4550_v11 = vld [vmem:[#allocation7 + $0x948] ss:$16 sps:$4 sm:$0xff]  }
 0x192   :  { %2492 = vmatpush1.bf16.msra.mxu0 %v4463_v12  ;;  %2738 = vmatpush1.bf16.msra.mxu1 %v4466_v14  ;;  %v4555_v12 = vld [vmem:[#allocation7 + $0x964] ss:$16 sps:$4 sm:$0xff]   ;;  %v4558_v14 = vld [vmem:[#allocation7 + $0x96c] ss:$16 sps:$4 sm:$0xff]  }
 0x193   :  { %2493 = vmatprep.subr.bf16.mxu0 %v4471_v16  ;;  %2739 = vmatprep.subr.bf16.mxu1 %v4474_v17  ;;  %v4553_v16 = vld [vmem:[#allocation7 + $0x960] ss:$16 sps:$4 sm:$0xff]   ;;  %v4556_v17 = vld [vmem:[#allocation7 + $0x968] ss:$16 sps:$4 sm:$0xff]  }
 0x196   :  { %2494 = vmatpush1.bf16.msra.mxu0 %v4469_v18  ;;  %2740 = vmatpush1.bf16.msra.mxu1 %v4472_v19  ;;  %v4561_v18 = vld [vmem:[#allocation7 + $0x984] ss:$16 sps:$4 sm:$0xff]   ;;  %v4564_v19 = vld [vmem:[#allocation7 + $0x98c] ss:$16 sps:$4 sm:$0xff]  }
 0x197   :  { %2495 = vmatprep.subr.bf16.mxu0 %v4477_v52  ;;  %2741 = vmatprep.subr.bf16.mxu1 %v4480_v20  ;;  %v4559_v52 = vld [vmem:[#allocation7 + $0x980] ss:$16 sps:$4 sm:$0xff]   ;;  %v4562_v20 = vld [vmem:[#allocation7 + $0x988] ss:$16 sps:$4 sm:$0xff]  }
 0x19a   :  { %2496 = vmatpush1.bf16.msra.mxu0 %v4475_v21  ;;  %2742 = vmatpush1.bf16.msra.mxu1 %v4478_v22  ;;  %v4567_v21 = vld [vmem:[#allocation7 + $0x9a4] ss:$16 sps:$4 sm:$0xff]   ;;  %v4570_v22 = vld [vmem:[#allocation7 + $0x9ac] ss:$16 sps:$4 sm:$0xff]  }
 0x19b   :  { %2497 = vmatprep.subr.bf16.mxu0 %v4483_v23  ;;  %2743 = vmatprep.subr.bf16.mxu1 %v4486_v24  ;;  %v4565_v23 = vld [vmem:[#allocation7 + $0x9a0] ss:$16 sps:$4 sm:$0xff]   ;;  %v4568_v24 = vld [vmem:[#allocation7 + $0x9a8] ss:$16 sps:$4 sm:$0xff]  }
 0x19e   :  { %2498 = vmatpush1.bf16.msra.mxu0 %v4481_v28  ;;  %2744 = vmatpush1.bf16.msra.mxu1 %v4484_v13  ;;  %v4573_v28 = vld [vmem:[#allocation7 + $0x9c4] ss:$16 sps:$4 sm:$0xff]   ;;  %v4576_v13 = vld [vmem:[#allocation7 + $0x9cc] ss:$16 sps:$4 sm:$0xff]  }
 0x19f   :  { %2508 = vmatprep.subr.bf16.mxu0 %v4489_v29  ;;  %2754 = vmatprep.subr.bf16.mxu1 %v4492_v30  ;;  %v4571_v29 = vld [vmem:[#allocation7 + $0x9c0] ss:$16 sps:$4 sm:$0xff]   ;;  %v4574_v30 = vld [vmem:[#allocation7 + $0x9c8] ss:$16 sps:$4 sm:$0xff]  }
 0x1a1   :  { %2500 = vmatmul.mubr.bf16.vlgmr.msra.gmra.mrb[0].mxu0 %v547_v33  ;;  %2746 = vmatmul.mubr.bf16.vlgmr.msra.gmra.mrb[0].mxu1 %v547_v33  ;;  %v4580_v33 = vld [vmem:[#allocation7 + $0x9e8] ss:$16 sps:$4 sm:$0xff]  }
 0x1a2   :  { %2509 = vmatpush1.bf16.msra.mxu0 %v4487_v31  ;;  %2755 = vmatpush1.bf16.msra.mxu1 %v4490_v32  ;;  %v4579_v31 = vld [vmem:[#allocation7 + $0x9e4] ss:$16 sps:$4 sm:$0xff]   ;;  %v4582_v32 = vld [vmem:[#allocation7 + $0x9ec] ss:$16 sps:$4 sm:$0xff]  }
 0x1a3   :  { %2510 = vmatprep.subr.bf16.mxu0 %v4495_v34  ;;  %2756 = vmatprep.subr.bf16.mxu1 %v4498_v35  ;;  %v4585_v34 = vld [vmem:[#allocation7 + $0xa04] ss:$16 sps:$4 sm:$0xff]   ;;  %v4588_v35 = vld [vmem:[#allocation7 + $0xa0c] ss:$16 sps:$4 sm:$0xff]  }
 0x1a4   :  { %2540 = vmatprep.mubr.bf16.mxu0 %v571_v25  ;;  %2786 = vmatprep.mubr.bf16.mxu1 %v571_v25  ;;  %v5167_v25 = vrot.slane %v5158_v26, %v5124_v49  ;;  %v4597_v26 = vld [vmem:[#allocation7 + $0xa44] ss:$16 sps:$4 sm:$0xff]  }
 0x1a6   :  { %2511 = vmatpush1.bf16.msra.mxu0 %v4493_v36  ;;  %2757 = vmatpush1.bf16.msra.mxu1 %v4496_v37  ;;  %v4583_v36 = vld [vmem:[#allocation7 + $0xa00] ss:$16 sps:$4 sm:$0xff]   ;;  %v4586_v37 = vld [vmem:[#allocation7 + $0xa08] ss:$16 sps:$4 sm:$0xff]  }
 0x1a7   :  { %2512 = vmatprep.subr.bf16.mxu0 %v4501_v38  ;;  %2758 = vmatprep.subr.bf16.mxu1 %v4504_v39  ;;  %v4591_v38 = vld [vmem:[#allocation7 + $0xa24] ss:$16 sps:$4 sm:$0xff]   ;;  %v4594_v39 = vld [vmem:[#allocation7 + $0xa2c] ss:$16 sps:$4 sm:$0xff]  }
 0x1aa   :  { %2513 = vmatpush1.bf16.msra.mxu0 %v4499_v27  ;;  %2759 = vmatpush1.bf16.msra.mxu1 %v4502_v40  ;;  %v4589_v27 = vld [vmem:[#allocation7 + $0xa20] ss:$16 sps:$4 sm:$0xff]   ;;  %v4592_v40 = vld [vmem:[#allocation7 + $0xa28] ss:$16 sps:$4 sm:$0xff]  }
 0x1ab   :  { %2514 = vmatprep.subr.bf16.mxu0 %v4507_v41  ;;  %2760 = vmatprep.subr.bf16.mxu1 %v4510_v42  ;;  %v4600_v41 = vld [vmem:[#allocation7 + $0xa4c] ss:$16 sps:$4 sm:$0xff]   ;;  %v4957_v42 = vmov 0  }
 0x1ae   :  { %2515 = vmatpush1.bf16.msra.mxu0 %v4505_v44  ;;  %2761 = vmatpush1.bf16.msra.mxu1 %v4508_v45  ;;  %v4595_v44 = vld [vmem:[#allocation7 + $0xa40] ss:$16 sps:$4 sm:$0xff]   ;;  %v4598_v45 = vld [vmem:[#allocation7 + $0xa48] ss:$16 sps:$4 sm:$0xff]  }
 0x1af   :  { %2516 = vmatprep.subr.bf16.mxu0 %v4513_v46  ;;  %2762 = vmatprep.subr.bf16.mxu1 %v4516_v47  ;;  %v4603_v46 = vld [vmem:[#allocation7 + $0xa64] ss:$16 sps:$4 sm:$0xff]   ;;  %v4606_v47 = vld [vmem:[#allocation7 + $0xa6c] ss:$16 sps:$4 sm:$0xff]  }
 0x1b2   :  { %2517 = vmatpush1.bf16.msra.mxu0 %v4511_v48  ;;  %2763 = vmatpush1.bf16.msra.mxu1 %v4514_v50  ;;  %v4601_v48 = vld [vmem:[#allocation7 + $0xa60] ss:$16 sps:$4 sm:$0xff]   ;;  %v4604_v50 = vld [vmem:[#allocation7 + $0xa68] ss:$16 sps:$4 sm:$0xff]  }
 0x1b3   :  { %2518 = vmatprep.subr.bf16.mxu0 %v4519_v51  ;;  %2764 = vmatprep.subr.bf16.mxu1 %v4522_v53  ;;  %v4609_v51 = vld [vmem:[#allocation7 + $0xa84] ss:$16 sps:$4 sm:$0xff]   ;;  %v4612_v53 = vld [vmem:[#allocation7 + $0xa8c] ss:$16 sps:$4 sm:$0xff]  }
 0x1b6   :  { %2519 = vmatpush1.bf16.msra.mxu0 %v4517_v54  ;;  %2765 = vmatpush1.bf16.msra.mxu1 %v4520_v55  ;;  %v4607_v54 = vld [vmem:[#allocation7 + $0xa80] ss:$16 sps:$4 sm:$0xff]   ;;  %v4610_v55 = vld [vmem:[#allocation7 + $0xa88] ss:$16 sps:$4 sm:$0xff]  }
 0x1b7   :  { %2520 = vmatprep.subr.bf16.mxu0 %v4525_v56  ;;  %2766 = vmatprep.subr.bf16.mxu1 %v4528_v57  ;;  %v4615_v56 = vld [vmem:[#allocation7 + $0xaa4] ss:$16 sps:$4 sm:$0xff]   ;;  %v4618_v57 = vld [vmem:[#allocation7 + $0xaac] ss:$16 sps:$4 sm:$0xff]  }
 0x1ba   :  { %2521 = vmatpush1.bf16.msra.mxu0 %v4523_v58  ;;  %2767 = vmatpush1.bf16.msra.mxu1 %v4526_v59  ;;  %v4613_v58 = vld [vmem:[#allocation7 + $0xaa0] ss:$16 sps:$4 sm:$0xff]   ;;  %v4616_v59 = vld [vmem:[#allocation7 + $0xaa8] ss:$16 sps:$4 sm:$0xff]  }
 0x1bb   :  { %2522 = vmatprep.subr.bf16.mxu0 %v4531_v60  ;;  %2768 = vmatprep.subr.bf16.mxu1 %v4534_v61  ;;  %v4621_v60 = vld [vmem:[#allocation7 + $0xac4] ss:$16 sps:$4 sm:$0xff]   ;;  %v4624_v61 = vld [vmem:[#allocation7 + $0xacc] ss:$16 sps:$4 sm:$0xff]  }
 0x1be   :  { %2523 = vmatpush1.bf16.msra.mxu0 %v4529_v62  ;;  %2769 = vmatpush1.bf16.msra.mxu1 %v4532_v63  ;;  %v4619_v62 = vld [vmem:[#allocation7 + $0xac0] ss:$16 sps:$4 sm:$0xff]   ;;  %v4622_v63 = vld [vmem:[#allocation7 + $0xac8] ss:$16 sps:$4 sm:$0xff]  }
 0x1bf   :  { %2524 = vmatprep.subr.bf16.mxu0 %v4537_v0  ;;  %2770 = vmatprep.subr.bf16.mxu1 %v4540_v1  ;;  %v4627_v0 = vld [vmem:[#allocation7 + $0xae4] ss:$16 sps:$4 sm:$0xff]   ;;  %v4630_v1 = vld [vmem:[#allocation7 + $0xaec] ss:$16 sps:$4 sm:$0xff]  }
 0x1c2   :  { %2525 = vmatpush1.bf16.msra.mxu0 %v4535_v2  ;;  %2771 = vmatpush1.bf16.msra.mxu1 %v4538_v3  ;;  %v3980_v2 = vld.sshfl [vmem:[#allocation13] sm:$0x33 pattern:$0x76325410]  ;;  %v4625_v3 = vld [vmem:[#allocation7 + $0xae0] ss:$16 sps:$4 sm:$0xff]  }
 0x1c3   :  { %2526 = vmatprep.subr.bf16.mxu0 %v4543_v4  ;;  %2772 = vmatprep.subr.bf16.mxu1 %v4546_v5  ;;  %v4628_v4 = vld [vmem:[#allocation7 + $0xae8] ss:$16 sps:$4 sm:$0xff]   ;;  %v3127_v5 = vcombine.high %v3980_v2, %v3980_v2 }
 0x1c6   :  { %2527 = vmatpush1.bf16.msra.mxu0 %v4541_v6  ;;  %2773 = vmatpush1.bf16.msra.mxu1 %v4544_v7  ;;  %v572_v6 = vcombine.high %v5167_v25, %v5167_v25  ;;  %v3133_v7 = vsel %vm2836_vm0, %v3980_v2, 0  ;;  %v4709_v2 = vld [vmem:[#allocation11 + $0xd0] ss:$8 sps:$4 sm:$0xff]  }
 0x1c7   :  { %2528 = vmatprep.subr.bf16.mxu0 %v4549_v8  ;;  %2774 = vmatprep.subr.bf16.mxu1 %v4552_v9  ;;  %v3045_v8 = vld [vmem:[#allocation5] sm:$0x3] }
 0x1c8   :  { %v3118_v9 = vpack.c.bf16 %v3045_v8, %v3045_v8  ;;  %v4723_v8 = vld [vmem:[#allocation11 + $0xf4] ss:$8 sps:$4 sm:$0xff]  }
 0x1ca   :  { %2529 = vmatpush1.bf16.msra.mxu0 %v4547_v10  ;;  %2775 = vmatpush1.bf16.msra.mxu1 %v4550_v11  ;;  %v4633_v10 = vld [vmem:[#allocation11 + $0x4] ss:$8 sps:$4 sm:$0xff]  }
 0x1cb   :  { %2530 = vmatprep.subr.bf16.mxu0 %v4555_v12  ;;  %2776 = vmatprep.subr.bf16.mxu1 %v4558_v14  ;;  %v4636_v11 = vld [vmem:[#allocation11 + $0x104] ss:$8 sps:$4 sm:$0xff]   ;;  %v4631_v12 = vld [vmem:[#allocation11] ss:$8 sps:$4 sm:$0xff]  }
 0x1cc   :  { %v4634_v14 = vld [vmem:[#allocation11 + $0x100] ss:$8 sps:$4 sm:$0xff]  }
 0x1ce   :  { %2531 = vmatpush1.bf16.msra.mxu0 %v4553_v16  ;;  %2777 = vmatpush1.bf16.msra.mxu1 %v4556_v17  ;;  %v4639_v16 = vld [vmem:[#allocation11 + $0x14] ss:$8 sps:$4 sm:$0xff]  }
 0x1cf   :  { %2532 = vmatprep.subr.bf16.mxu0 %v4561_v18  ;;  %2778 = vmatprep.subr.bf16.mxu1 %v4564_v19  ;;  %v4642_v17 = vld [vmem:[#allocation11 + $0x114] ss:$8 sps:$4 sm:$0xff]   ;;  %v4637_v18 = vld [vmem:[#allocation11 + $0x10] ss:$8 sps:$4 sm:$0xff]  }
 0x1d0   :  { %v4640_v19 = vld [vmem:[#allocation11 + $0x110] ss:$8 sps:$4 sm:$0xff]  }
 0x1d2   :  { %2533 = vmatpush1.bf16.msra.mxu0 %v4559_v52  ;;  %2779 = vmatpush1.bf16.msra.mxu1 %v4562_v20  ;;  %v4645_v52 = vld [vmem:[#allocation11 + $0x24] ss:$8 sps:$4 sm:$0xff]  }
 0x1d3   :  { %2534 = vmatprep.subr.bf16.mxu0 %v4567_v21  ;;  %2780 = vmatprep.subr.bf16.mxu1 %v4570_v22  ;;  %v4648_v20 = vld [vmem:[#allocation11 + $0x124] ss:$8 sps:$4 sm:$0xff]   ;;  %v4643_v21 = vld [vmem:[#allocation11 + $0x20] ss:$8 sps:$4 sm:$0xff]  }
 0x1d4   :  { %v4646_v22 = vld [vmem:[#allocation11 + $0x120] ss:$8 sps:$4 sm:$0xff]  }
 0x1d6   :  { %2535 = vmatpush1.bf16.msra.mxu0 %v4565_v23  ;;  %2781 = vmatpush1.bf16.msra.mxu1 %v4568_v24  ;;  %v4651_v23 = vld [vmem:[#allocation11 + $0x34] ss:$8 sps:$4 sm:$0xff]  }
 0x1d7   :  { %2536 = vmatprep.subr.bf16.mxu0 %v4573_v28  ;;  %2782 = vmatprep.subr.bf16.mxu1 %v4576_v13  ;;  %v4654_v24 = vld [vmem:[#allocation11 + $0x134] ss:$8 sps:$4 sm:$0xff]   ;;  %v4649_v28 = vld [vmem:[#allocation11 + $0x30] ss:$8 sps:$4 sm:$0xff]  }
 0x1d8   :  { %v4652_v13 = vld [vmem:[#allocation11 + $0x130] ss:$8 sps:$4 sm:$0xff]  }
 0x1da   :  { %2537 = vmatpush1.bf16.msra.mxu0 %v4571_v29  ;;  %2783 = vmatpush1.bf16.msra.mxu1 %v4574_v30  ;;  %v4657_v29 = vld [vmem:[#allocation11 + $0x44] ss:$8 sps:$4 sm:$0xff]  }
 0x1db   :  { %2538 = vmatprep.subr.bf16.mxu0 %v4579_v31  ;;  %2784 = vmatprep.subr.bf16.mxu1 %v4582_v32  ;;  %v4660_v30 = vld [vmem:[#allocation11 + $0x144] ss:$8 sps:$4 sm:$0xff]   ;;  %v4655_v31 = vld [vmem:[#allocation11 + $0x40] ss:$8 sps:$4 sm:$0xff]  }
 0x1dc   :  { %v4658_v32 = vld [vmem:[#allocation11 + $0x140] ss:$8 sps:$4 sm:$0xff]  }
 0x1de   :  { %2539 = vmatpush1.bf16.msra.mxu0 %v4577_v15  ;;  %2785 = vmatpush1.bf16.msra.mxu1 %v4580_v33  ;;  %v4663_v15 = vld [vmem:[#allocation11 + $0x54] ss:$8 sps:$4 sm:$0xff]  }
 0x1df   :  { %2549 = vmatprep.subr.bf16.mxu0 %v4585_v34  ;;  %2795 = vmatprep.subr.bf16.mxu1 %v4588_v35  ;;  %v4666_v33 = vld [vmem:[#allocation11 + $0x154] ss:$8 sps:$4 sm:$0xff]   ;;  %v4661_v34 = vld [vmem:[#allocation11 + $0x50] ss:$8 sps:$4 sm:$0xff]  }
 0x1e0   :  { %v4664_v35 = vld [vmem:[#allocation11 + $0x150] ss:$8 sps:$4 sm:$0xff]  }
 0x1e1   :  { %2541 = vmatmul.mubr.bf16.vlgmr.msra.gmra.mrb[0].mxu0 %v5167_v25  ;;  %2787 = vmatmul.mubr.bf16.vlgmr.msra.gmra.mrb[0].mxu1 %v5167_v25  ;;  %v4669_v25 = vld [vmem:[#allocation11 + $0x64] ss:$8 sps:$4 sm:$0xff]  }
 0x1e2   :  { %2550 = vmatpush1.bf16.msra.mxu0 %v4583_v36  ;;  %2796 = vmatpush1.bf16.msra.mxu1 %v4586_v37  ;;  %v4672_v36 = vld [vmem:[#allocation11 + $0x164] ss:$8 sps:$4 sm:$0xff]   ;;  %v4667_v37 = vld [vmem:[#allocation11 + $0x60] ss:$8 sps:$4 sm:$0xff]  }
 0x1e3   :  { %2551 = vmatprep.subr.bf16.mxu0 %v4591_v38  ;;  %2797 = vmatprep.subr.bf16.mxu1 %v4594_v39  ;;  %v4670_v38 = vld [vmem:[#allocation11 + $0x160] ss:$8 sps:$4 sm:$0xff]   ;;  %v4675_v39 = vld [vmem:[#allocation11 + $0x74] ss:$8 sps:$4 sm:$0xff]  }
 0x1e4   :  { %2581 = vmatprep.mubr.bf16.mxu0 %v4957_v42  ;;  %2827 = vmatprep.mubr.bf16.mxu1 %v4957_v42 }
 0x1e6   :  { %2552 = vmatpush1.bf16.msra.mxu0 %v4589_v27  ;;  %2798 = vmatpush1.bf16.msra.mxu1 %v4592_v40  ;;  %v4678_v27 = vld [vmem:[#allocation11 + $0x174] ss:$8 sps:$4 sm:$0xff]   ;;  %v4673_v40 = vld [vmem:[#allocation11 + $0x70] ss:$8 sps:$4 sm:$0xff]  }
 0x1e7   :  { %2553 = vmatprep.subr.bf16.mxu0 %v4597_v26  ;;  %2799 = vmatprep.subr.bf16.mxu1 %v4600_v41  ;;  %v4676_v26 = vld [vmem:[#allocation11 + $0x170] ss:$8 sps:$4 sm:$0xff]   ;;  %v4681_v41 = vld [vmem:[#allocation11 + $0x84] ss:$8 sps:$4 sm:$0xff]  }
 0x1ea   :  { %2554 = vmatpush1.bf16.msra.mxu0 %v4595_v44  ;;  %2800 = vmatpush1.bf16.msra.mxu1 %v4598_v45  ;;  %v4679_v44 = vld [vmem:[#allocation11 + $0x80] ss:$8 sps:$4 sm:$0xff]  }
 0x1eb   :  { %2555 = vmatprep.subr.bf16.mxu0 %v4603_v46  ;;  %2801 = vmatprep.subr.bf16.mxu1 %v4606_v47  ;;  %v4682_v45 = vld [vmem:[#allocation11 + $0x180] ss:$8 sps:$4 sm:$0xff]   ;;  %v4687_v46 = vld [vmem:[#allocation11 + $0x94] ss:$8 sps:$4 sm:$0xff]  }
 0x1ec   :  { %v4690_v47 = vld [vmem:[#allocation11 + $0x194] ss:$8 sps:$4 sm:$0xff]  }
 0x1ee   :  { %2556 = vmatpush1.bf16.msra.mxu0 %v4601_v48  ;;  %2802 = vmatpush1.bf16.msra.mxu1 %v4604_v50  ;;  %v4685_v48 = vld [vmem:[#allocation11 + $0x90] ss:$8 sps:$4 sm:$0xff]  }
 0x1ef   :  { %2557 = vmatprep.subr.bf16.mxu0 %v4609_v51  ;;  %2803 = vmatprep.subr.bf16.mxu1 %v4612_v53  ;;  %v4688_v50 = vld [vmem:[#allocation11 + $0x190] ss:$8 sps:$4 sm:$0xff]   ;;  %v4693_v51 = vld [vmem:[#allocation11 + $0xa4] ss:$8 sps:$4 sm:$0xff]  }
 0x1f0   :  { %v4696_v53 = vld [vmem:[#allocation11 + $0x1a4] ss:$8 sps:$4 sm:$0xff]  }
 0x1f2   :  { %2558 = vmatpush1.bf16.msra.mxu0 %v4607_v54  ;;  %2804 = vmatpush1.bf16.msra.mxu1 %v4610_v55  ;;  %v4691_v54 = vld [vmem:[#allocation11 + $0xa0] ss:$8 sps:$4 sm:$0xff]  }
 0x1f3   :  { %2559 = vmatprep.subr.bf16.mxu0 %v4615_v56  ;;  %2805 = vmatprep.subr.bf16.mxu1 %v4618_v57  ;;  %v4694_v55 = vld [vmem:[#allocation11 + $0x1a0] ss:$8 sps:$4 sm:$0xff]   ;;  %v4699_v56 = vld [vmem:[#allocation11 + $0xb4] ss:$8 sps:$4 sm:$0xff]  }
 0x1f4   :  { %v4702_v57 = vld [vmem:[#allocation11 + $0x1b4] ss:$8 sps:$4 sm:$0xff]  }
 0x1f6   :  { %2560 = vmatpush1.bf16.msra.mxu0 %v4613_v58  ;;  %2806 = vmatpush1.bf16.msra.mxu1 %v4616_v59  ;;  %v4697_v58 = vld [vmem:[#allocation11 + $0xb0] ss:$8 sps:$4 sm:$0xff]  }
 0x1f7   :  { %2561 = vmatprep.subr.bf16.mxu0 %v4621_v60  ;;  %2807 = vmatprep.subr.bf16.mxu1 %v4624_v61  ;;  %v4700_v59 = vld [vmem:[#allocation11 + $0x1b0] ss:$8 sps:$4 sm:$0xff]   ;;  %v4705_v60 = vld [vmem:[#allocation11 + $0xc4] ss:$8 sps:$4 sm:$0xff]  }
 0x1f8   :  { %v4708_v61 = vld [vmem:[#allocation11 + $0x1c4] ss:$8 sps:$4 sm:$0xff]  }
 0x1fa   :  { %2562 = vmatpush1.bf16.msra.mxu0 %v4619_v62  ;;  %2808 = vmatpush1.bf16.msra.mxu1 %v4622_v63  ;;  %v4703_v62 = vld [vmem:[#allocation11 + $0xc0] ss:$8 sps:$4 sm:$0xff]  }
 0x1fb   :  { %2563 = vmatprep.subr.bf16.mxu0 %v4627_v0  ;;  %2809 = vmatprep.subr.bf16.mxu1 %v4630_v1  ;;  %v4706_v63 = vld [vmem:[#allocation11 + $0x1c0] ss:$8 sps:$4 sm:$0xff]   ;;  %v4711_v0 = vld [vmem:[#allocation11 + $0xd4] ss:$8 sps:$4 sm:$0xff]  }
 0x1fc   :  { %v4714_v1 = vld [vmem:[#allocation11 + $0x1d4] ss:$8 sps:$4 sm:$0xff]  }
 0x1fe   :  { %2564 = vmatpush1.bf16.msra.mxu0 %v4625_v3  ;;  %2810 = vmatpush1.bf16.msra.mxu1 %v4628_v4  ;;  %v4712_v3 = vld [vmem:[#allocation11 + $0x1d0] ss:$8 sps:$4 sm:$0xff]   ;;  %v4717_v4 = vld [vmem:[#allocation11 + $0xe4] ss:$8 sps:$4 sm:$0xff]  }
 0x1ff   :  { %3981 = vmatprep.subr.msk.bf16.mxu0 %vm2836_vm0, %v3127_v5  ;;  %3499 = vmatprep.subr.bf16.mxu1 %v4633_v10  ;;  %v4720_v5 = vld [vmem:[#allocation11 + $0x1e4] ss:$8 sps:$4 sm:$0xff]   ;;  %v4721_v10 = vld [vmem:[#allocation11 + $0xf0] ss:$8 sps:$4 sm:$0xff]  }
 0x201   :  { %2582 = vmatmul.mubr.bf16.vlgmr.msra.gmra.mrb[0].mxu0 %v572_v6  ;;  %2828 = vmatmul.mubr.bf16.vlgmr.msra.gmra.mrb[0].mxu1 %v572_v6  ;;  %v4715_v6 = vld [vmem:[#allocation11 + $0xe0] ss:$8 sps:$4 sm:$0xff]  }
 0x202   :  { %3170 = vmatprep.mubr.bf16.mxu0 %v4957_v42  ;;  %3139 = vmatpush1.bf16.msra.mxu0 %v3133_v7  ;;  %v4684_v42 = vld [vmem:[#allocation11 + $0x184] ss:$8 sps:$4 sm:$0xff]   ;;  %v4718_v7 = vld [vmem:[#allocation11 + $0x1e0] ss:$8 sps:$4 sm:$0xff]  }
 0x203   :  { %3540 = vmatprep.subr.bf16.mxu0 %v4636_v11  ;;  %3500 = vmatpush1.bf16.msra.mxu1 %v4631_v12  ;;  %v4724_v11 = vld [vmem:[#allocation11 + $0x1f0] ss:$8 sps:$4 sm:$0xff]  }
 0x204   :  { %3501 = vmatprep.subr.bf16.mxu1 %v4639_v16 }
 0x207   :  { %3502 = vmatpush1.bf16.msra.mxu1 %v4637_v18 }
 0x208   :  { %3503 = vmatprep.subr.bf16.mxu1 %v4645_v52 }
 0x209   :  { %3982 = vmatmul.mubr.msk.bf16.vlgmr.msra.gmra.mrb[4].mxu0 %vm3128_vm1, %v3118_v9  ;;  %v4726_v9 = vld [vmem:[#allocation11 + $0x1f4] ss:$8 sps:$4 sm:$0xff]  }
 0x20a   :  { %3541 = vmatpush1.bf16.msra.mxu0 %v4634_v14 }
 0x20b   :  { %3542 = vmatprep.subr.bf16.mxu0 %v4642_v17  ;;  %3504 = vmatpush1.bf16.msra.mxu1 %v4643_v21 }
 0x20c   :  { %3505 = vmatprep.subr.bf16.mxu1 %v4651_v23 }
 0x20e   :  { %3543 = vmatpush1.bf16.msra.mxu0 %v4640_v19 }
 0x20f   :  { %3544 = vmatprep.subr.bf16.mxu0 %v4648_v20  ;;  %3506 = vmatpush1.bf16.msra.mxu1 %v4649_v28 }
 0x210   :  { %3507 = vmatprep.subr.bf16.mxu1 %v4657_v29 }
 0x212   :  { %3545 = vmatpush1.bf16.msra.mxu0 %v4646_v22 }
 0x213   :  { %3546 = vmatprep.subr.bf16.mxu0 %v4654_v24  ;;  %3508 = vmatpush1.bf16.msra.mxu1 %v4655_v31 }
 0x214   :  { %3509 = vmatprep.subr.bf16.mxu1 %v4663_v15 }
 0x216   :  { %3547 = vmatpush1.bf16.msra.mxu0 %v4652_v13 }
 0x217   :  { %3548 = vmatprep.subr.bf16.mxu0 %v4660_v30  ;;  %3510 = vmatpush1.bf16.msra.mxu1 %v4661_v34 }
 0x218   :  { %3511 = vmatprep.subr.bf16.mxu1 %v4669_v25 }
 0x21a   :  { %3549 = vmatpush1.bf16.msra.mxu0 %v4658_v32 }
 0x21b   :  { %3550 = vmatprep.subr.bf16.mxu0 %v4666_v33  ;;  %3512 = vmatpush1.bf16.msra.mxu1 %v4667_v37 }
 0x21c   :  { %3513 = vmatprep.subr.bf16.mxu1 %v4675_v39 }
 0x21e   :  { %3551 = vmatpush1.bf16.msra.mxu0 %v4664_v35 }
 0x21f   :  { %3552 = vmatprep.subr.bf16.mxu0 %v4672_v36  ;;  %3514 = vmatpush1.bf16.msra.mxu1 %v4673_v40 }
 0x220   :  { %3515 = vmatprep.subr.bf16.mxu1 %v4681_v41 }
 0x222   :  { %3553 = vmatpush1.bf16.msra.mxu0 %v4670_v38 }
 0x223   :  { %3554 = vmatprep.subr.bf16.mxu0 %v4678_v27  ;;  %3516 = vmatpush1.bf16.msra.mxu1 %v4679_v44 }
 0x224   :  { %3517 = vmatprep.subr.bf16.mxu1 %v4687_v46 }
 0x226   :  { %3555 = vmatpush1.bf16.msra.mxu0 %v4676_v26 }
 0x227   :  { %3556 = vmatprep.subr.bf16.mxu0 %v4684_v42  ;;  %3518 = vmatpush1.bf16.msra.mxu1 %v4685_v48 }
 0x228   :  { %3519 = vmatprep.subr.bf16.mxu1 %v4693_v51 }
 0x22a   :  { %3557 = vmatpush1.bf16.msra.mxu0 %v4682_v45 }
 0x22b   :  { %3558 = vmatprep.subr.bf16.mxu0 %v4690_v47  ;;  %3520 = vmatpush1.bf16.msra.mxu1 %v4691_v54 }
 0x22c   :  { %3521 = vmatprep.subr.bf16.mxu1 %v4699_v56 }
 0x22e   :  { %3559 = vmatpush1.bf16.msra.mxu0 %v4688_v50 }
 0x22f   :  { %3560 = vmatprep.subr.bf16.mxu0 %v4696_v53  ;;  %3522 = vmatpush1.bf16.msra.mxu1 %v4697_v58 }
 0x230   :  { %3523 = vmatprep.subr.bf16.mxu1 %v4705_v60 }
 0x232   :  { %3561 = vmatpush1.bf16.msra.mxu0 %v4694_v55 }
 0x233   :  { %3562 = vmatprep.subr.bf16.mxu0 %v4702_v57  ;;  %3524 = vmatpush1.bf16.msra.mxu1 %v4703_v62 }
 0x234   :  { %3525 = vmatprep.subr.bf16.mxu1 %v4711_v0 }
 0x236   :  { %3563 = vmatpush1.bf16.msra.mxu0 %v4700_v59 }
 0x237   :  { %3564 = vmatprep.subr.bf16.mxu0 %v4708_v61  ;;  %3526 = vmatpush1.bf16.msra.mxu1 %v4709_v2 }
 0x238   :  { %3527 = vmatprep.subr.bf16.mxu1 %v4717_v4 }
 0x23a   :  { %3565 = vmatpush1.bf16.msra.mxu0 %v4706_v63 }
 0x23b   :  { %3566 = vmatprep.subr.bf16.mxu0 %v4714_v1  ;;  %3528 = vmatpush1.bf16.msra.mxu1 %v4715_v6 }
 0x23c   :  { %3529 = vmatprep.subr.bf16.mxu1 %v4723_v8 }
 0x23e   :  { %3567 = vmatpush1.bf16.msra.mxu0 %v4712_v3 }
 0x23f   :  { %3568 = vmatprep.subr.bf16.mxu0 %v4720_v5  ;;  %3530 = vmatpush1.bf16.msra.mxu1 %v4721_v10 }
 0x242   :  { %3569 = vmatpush1.bf16.msra.mxu0 %v4718_v7 }
 0x243   :  { %3570 = vmatprep.subr.bf16.mxu0 %v4726_v9 }
 0x246   :  { %3571 = vmatpush1.bf16.msra.mxu0 %v4724_v11 }
 0x2d4   :  { %v5175_v12 = vpop.f32.mrb[0].mxu0  ;;  %v5177_v14 = vpop.f32.mrb[0].mxu1 }
 0x2d5   :  { %v2837_v16 = vsel %vm2836_vm0, %v5175_v12, 0.0  ;;  %v2865_v17 = vmul.f32 %v5175_v12, %v5175_v12  ;;  %v2851_v18 = vsel %vm2836_vm0, %v5177_v14, 0.0  ;;  %v2867_v19 = vmul.f32 %v5177_v14, %v5177_v14  ;;  %v5187_v52 = vpop.f32.mrb[1].mxu0  ;;  %v5189_v20 = vpop.f32.mrb[1].mxu1 }
 0x2d6   :  { %v2838_v21 = vrot.slane %v2837_v16, 4  ;;  %v2852_v22 = vrot.slane %v2851_v18, 4  ;;  %v2844_v23 = vsel %vm2836_vm0, %v5187_v52, 0.0  ;;  %v2866_v24 = vmul.f32 %v5187_v52, %v5187_v52  ;;  %v2587_v28 = vpop.f32.mrb[2].mxu0  ;;  %v2833_v13 = vpop.f32.mrb[2].mxu1 }
 0x2d7   :  { %v2869_v29 = vsel %vm2836_vm0, %v2865_v17, 0.0  ;;  %v2883_v30 = vsel %vm2836_vm0, %v2867_v19, 0.0  ;;  %v2845_v31 = vrot.slane %v2844_v23, 4  ;;  %v2858_v32 = vsel %vm2836_vm0, %v5189_v20, 0.0  ;;  %v2588_v15 = vpop.f32.mrb[3].mxu0  ;;  %v2834_v33 = vpop.f32.mrb[3].mxu1 }
 0x2d8   :  { %v2839_v34 = vadd.f32 %v2838_v21, %v2837_v16  ;;  %v2870_v35 = vrot.slane %v2869_v29, 4  ;;  %v2853_v25 = vadd.f32 %v2852_v22, %v2851_v18  ;;  %v2884_v36 = vrot.slane %v2883_v30, 4 }
 0x2d9   :  { %v2846_v37 = vadd.f32 %v2845_v31, %v2844_v23  ;;  %v2876_v38 = vsel %vm2836_vm0, %v2866_v24, 0.0  ;;  %v2859_v39 = vrot.slane %v2858_v32, 4  ;;  %v2868_v27 = vmul.f32 %v5189_v20, %v5189_v20 }
 0x2da   :  { %v2840_v40 = vrot.slane %v2839_v34, 2  ;;  %v2871_v26 = vadd.f32 %v2870_v35, %v2869_v29  ;;  %v2854_v41 = vrot.slane %v2853_v25, 2  ;;  %v2885_v42 = vadd.f32 %v2884_v36, %v2883_v30 }
 0x2db   :  { %v2847_v44 = vrot.slane %v2846_v37, 2  ;;  %v2877_v45 = vrot.slane %v2876_v38, 4  ;;  %v2860_v46 = vadd.f32 %v2859_v39, %v2858_v32  ;;  %v2890_v47 = vsel %vm2836_vm0, %v2868_v27, 0.0 }
 0x2dc   :  { %v2841_v48 = vadd.f32 %v2840_v40, %v2839_v34  ;;  %v2872_v50 = vrot.slane %v2871_v26, 2  ;;  %v2855_v51 = vadd.f32 %v2854_v41, %v2853_v25  ;;  %v2886_v53 = vrot.slane %v2885_v42, 2 }
 0x2dd   :  { %v2848_v54 = vadd.f32 %v2847_v44, %v2846_v37  ;;  %v2878_v55 = vadd.f32 %v2877_v45, %v2876_v38  ;;  %v2861_v56 = vrot.slane %v2860_v46, 2  ;;  %v2891_v57 = vrot.slane %v2890_v47, 4 }
 0x2de   :  { %v2842_v58 = vrot.slane %v2841_v48, 1  ;;  %v2873_v59 = vadd.f32 %v2872_v50, %v2871_v26  ;;  %v2856_v60 = vrot.slane %v2855_v51, 1  ;;  %v2887_v61 = vadd.f32 %v2886_v53, %v2885_v42 }
 0x2df   :  { %v2849_v62 = vrot.slane %v2848_v54, 1  ;;  %v2879_v63 = vrot.slane %v2878_v55, 2  ;;  %v2862_v0 = vadd.f32 %v2861_v56, %v2860_v46  ;;  %v2892_v1 = vadd.f32 %v2891_v57, %v2890_v47  ;;  %v2897_v57 = vld [vmem:[#allocation8] sm:$0xf] }
 0x2e0   :  { %v2843_v2 = vadd.f32 %v2842_v58, %v2841_v48  ;;  %v2874_v3 = vrot.slane %v2873_v59, 1  ;;  %v2857_v4 = vadd.f32 %v2856_v60, %v2855_v51  ;;  %v2888_v5 = vrot.slane %v2887_v61, 1 }
 0x2e1   :  { %v2850_v6 = vadd.f32 %v2849_v62, %v2848_v54  ;;  %v2880_v7 = vadd.f32 %v2879_v63, %v2878_v55  ;;  %v2863_v8 = vrot.slane %v2862_v0, 1  ;;  %v2893_v9 = vrot.slane %v2892_v1, 2 }
 0x2e2   :  { %v2875_v10 = vadd.f32 %v2874_v3, %v2873_v59  ;;  %v2899_v11 = vmul.f32 0.5, %v2843_v2  ;;  %v2889_v16 = vadd.f32 %v2888_v5, %v2887_v61  ;;  %v2901_v17 = vmul.f32 0.5, %v2857_v4 }
 0x2e3   :  { %v2881_v18 = vrot.slane %v2880_v7, 1  ;;  %v2900_v19 = vmul.f32 0.5, %v2850_v6  ;;  %v2864_v21 = vadd.f32 %v2863_v8, %v2862_v0  ;;  %v2894_v22 = vadd.f32 %v2893_v9, %v2892_v1 }
 0x2e4   :  { %v2903_v23 = vmul.f32 0.5, %v2875_v10  ;;  %v2907_v24 = vmul.f32 %v2899_v11, %v2899_v11  ;;  %v2905_v28 = vmul.f32 0.5, %v2889_v16  ;;  %v2909_v13 = vmul.f32 %v2901_v17, %v2901_v17 }
 0x2e5   :  { %v2882_v29 = vadd.f32 %v2881_v18, %v2880_v7  ;;  %v2908_v30 = vmul.f32 %v2900_v19, %v2900_v19  ;;  %v2895_v31 = vrot.slane %v2894_v22, 1  ;;  %v2902_v32 = vmul.f32 0.5, %v2864_v21 }
 0x2e6   :  { %v2911_v15 = vsub.f32 %v2903_v23, %v2907_v24  ;;  %v2913_v33 = vsub.f32 %v2905_v28, %v2909_v13  ;;  %v2968_v58 = vsub.s32 2, %v5121_v43  ;;  %v2972_v60 = vsub.s32 3, %v5121_v43  ;;  %v2898_v24 = vld [vmem:[#allocation10] sm:$0xf] }
 0x2e7   :  { %v2904_v34 = vmul.f32 0.5, %v2882_v29  ;;  %v2896_v35 = vadd.f32 %v2895_v31, %v2894_v22  ;;  %v2910_v25 = vmul.f32 %v2902_v32, %v2902_v32  ;;  %v5209_v61 = vsub.s32 0, %v5121_v43 }
 0x2e8   :  { %v2915_v36 = vmax.f32 %v2911_v15, 0.0  ;;  %v2917_v37 = vmax.f32 %v2913_v33, 0.0  ;;  %v5212_v62 = vsub.s32 1, %v5121_v43 }
 0x2e9   :  { %v2912_v38 = vsub.f32 %v2904_v34, %v2908_v30  ;;  %v2906_v39 = vmul.f32 0.5, %v2896_v35 }
 0x2ea   :  { %v2919_v27 = vadd.f32 1e-05, %v2915_v36  ;;  %v2921_v40 = vadd.f32 1e-05, %v2917_v37 }
 0x2eb   :  { %v2916_v26 = vmax.f32 %v2912_v38, 0.0  ;;  %v2914_v41 = vsub.f32 %v2906_v39, %v2910_v25  ;;  %v3111_v39 = vld [vmem:[#allocation14] sm:$0x3] }
 0x2ec   :  { %4727 = vrsqrt.f32 %v2919_v27 }
 0x2ed   :  { %v2920_v42 = vadd.f32 1e-05, %v2916_v26  ;;  %v2918_v44 = vmax.f32 %v2914_v41, 0.0  ;;  %4729 = vrsqrt.f32 %v2921_v40  ;;  %v3585_v41 = vrot.slane %v3111_v39, %v5209_v61 }
 0x2ef   :  { %4731 = vrsqrt.f32 %v2920_v42  ;;  %v2922_v45 = vadd.f32 1e-05, %v2918_v44 }
 0x2f1   :  { %4733 = vrsqrt.f32 %v2922_v45 }
 0x2f6   :  { %v4728_v46 = vpop.eup %4727 }
 0x2f7   :  { %v4730_v47 = vpop.eup %4729 }
 0x2f9   :  { %v4732_v48 = vpop.eup %4731 }
 0x2fa   :  { %v2931_v50 = vcombine.low %v4728_v46, %v4732_v48  ;;  %v3589_v46 = vrot.slane %v3111_v39, %v5212_v62 }
 0x2fb   :  { %v4734_v51 = vpop.eup %4733 }
 0x2fc   :  { %v2932_v53 = vcombine.low %v4730_v47, %v4734_v51  ;;  %v2939_v54 = vrot.slane %v2931_v50, %v5124_v49  ;;  %v3112_v50 = vld [vmem:[#allocation16] sm:$0x3] }
 0x2fe   :  { %v2946_v55 = vrot.slane %v2932_v53, %v5124_v49 }
 0x300   :  { %v2947_v56 = vcombine.low %v2939_v54, %v2946_v55 }
 0x302   :  { %v2954_v59 = vrot.slane %v2947_v56, %v5124_v49 }
 0x304   :  { %v2956_v63 = vmul.f32 %v2954_v59, %v2897_v57  ;;  %v3600_v57 = vrot.slane %v3112_v50, %v5209_v61  ;;  %v3604_v59 = vrot.slane %v3112_v50, %v5212_v62 }
 0x306   :  { %v2969_v0 = vrot.slane %v2956_v63, %v2968_v58  ;;  %v2973_v1 = vrot.slane %v2956_v63, %v2972_v60  ;;  %v2961_v2 = vrot.slane %v2956_v63, %v5209_v61  ;;  %v2965_v3 = vrot.slane %v2956_v63, %v5212_v62 }
 0x308   :  { %v2980_v4 = vmul.f32 %v2969_v0, %v2901_v17  ;;  %v2981_v5 = vmul.f32 %v2973_v1, %v2902_v32  ;;  %v3015_v6 = vmul.f32 %v2973_v1, %v5189_v20  ;;  %v2978_v7 = vmul.f32 %v2961_v2, %v2899_v11 }
 0x309   :  { %v2979_v8 = vmul.f32 %v2965_v3, %v2900_v19  ;;  %v3013_v9 = vmul.f32 %v2965_v3, %v5187_v52  ;;  %v3012_v10 = vmul.f32 %v2961_v2, %v5175_v12  ;;  %v3014_v43 = vmul.f32 %v2969_v0, %v5177_v14 }
 0x30a   :  { %v2987_v16 = vcombine.low %v2980_v4, %v2981_v5  ;;  %v3614_v5 = vstv %s5246_s9 }
 0x30b   :  { %v2986_v18 = vcombine.low %v2978_v7, %v2979_v8 }
 0x30c   :  { %v3001_v21 = vrot.slane %v2987_v16, %v5124_v49 }
 0x30d   :  { %v2994_v22 = vrot.slane %v2986_v18, %v5124_v49 }
 0x30f   :  { %v3002_v23 = vcombine.low %v2994_v22, %v3001_v21 }
 0x311   :  { %v3009_v17 = vrot.slane %v3002_v23, %v5124_v49  ;;  %v3172_v49 = vpop.f32.mrb[4].mxu0 }
 0x312   :  { %v3174_v36 = vpop.f32.mrb[5].mxu0 }
 0x313   :  { %v3011_v28 = vsub.f32 %v2898_v24, %v3009_v17  ;;  %v3176_v37 = vpop.f32.mrb[6].mxu0 }
 0x314   :  { %v3177_v38 = vpop.f32.mrb[7].mxu0 }
 0x315   :  { %v3024_v20 = vrot.slane %v3011_v28, %v5212_v62  ;;  %v3032_v11 = vrot.slane %v3011_v28, %v2972_v60  ;;  %v3020_v52 = vrot.slane %v3011_v28, %v5209_v61  ;;  %v3028_v19 = vrot.slane %v3011_v28, %v2968_v58 }
 0x317   :  { %v3038_v12 = vadd.f32 %v3024_v20, %v3013_v9  ;;  %v3040_v13 = vadd.f32 %v3032_v11, %v3015_v6  ;;  %v3037_v14 = vadd.f32 %v3020_v52, %v3012_v10  ;;  %v3039_v29 = vadd.f32 %v3028_v19, %v3014_v43 }
 0x319   :  { %v3042_v30 = vmax.f32 %v3038_v12, 0.0  ;;  %v3044_v31 = vmax.f32 %v3040_v13, 0.0  ;;  %v3041_v32 = vmax.f32 %v3037_v14, 0.0  ;;  %v3043_v15 = vmax.f32 %v3039_v29, 0.0 }
 0x31b   :  { %v3115_v33 = vpack.c.bf16 %v3042_v30, %v3042_v30  ;;  %v3117_v34 = vpack.c.bf16 %v3044_v31, %v3044_v31  ;;  %v3114_v35 = vpack.c.bf16 %v3041_v32, %v3041_v32  ;;  %v3116_v25 = vpack.c.bf16 %v3043_v15, %v3043_v15 }
 0x31d   :  { %3531 = vmatprep.mubr.bf16.mxu1 %v3115_v33  ;;  %3572 = vmatprep.mubr.bf16.mxu0 %v3117_v34 }
 0x31e   :  { %3532 = vmatmul.mubr.bf16.vlgmr.msra.gmra.mrb[4].mxu1 %v3114_v35  ;;  %3573 = vmatmul.mubr.bf16.vlgmr.msra.gmra.mrb[8].mxu0 %v3116_v25 }
 0x3f1   :  { %v3533_v27 = vpop.f32.mrb[4].mxu1  ;;  %v3574_v40 = vpop.f32.mrb[8].mxu0 }
 0x3f2   :  { %v3534_v26 = vadd.f32 %v3533_v27, %v3172_v49  ;;  %v3535_v42 = vpop.f32.mrb[5].mxu1  ;;  %v3576_v44 = vpop.f32.mrb[9].mxu0 }
 0x3f3   :  { %v3536_v45 = vadd.f32 %v3535_v42, %v3174_v36  ;;  %v3537_v47 = vpop.f32.mrb[6].mxu1  ;;  %v3578_v48 = vpop.f32.mrb[10].mxu0 }
 0x3f4   :  { %v3575_v51 = vadd.f32 %v3574_v40, %v3534_v26  ;;  %v3538_v53 = vpop.f32.mrb[7].mxu1  ;;  %v3579_v54 = vpop.f32.mrb[11].mxu0 }
 0x3f5   :  { %v3577_v55 = vadd.f32 %v3576_v44, %v3536_v45 }
 0x3f6   :  { %v3592_v56 = vadd.f32 %v3585_v41, %v3575_v51 }
 0x3f7   :  { %v3593_v58 = vadd.f32 %v3589_v46, %v3577_v55 }
 0x3f8   :  { %v3594_v60 = vmax.f32 %v3592_v56, 0.0 }
 0x3f9   :  { %v3595_v63 = vmax.f32 %v3593_v58, 0.0 }
 0x3fa   :  { %v3607_v0 = vmul.f32 %v3600_v57, %v3594_v60 }
 0x3fb   :  { %v3608_v1 = vmul.f32 %v3604_v59, %v3595_v63 }
 0x3fc   :  { %v3609_v2 = vsel %vm2836_vm0, %v3607_v0, 0.0 }
 0x3fd   :  { %v3610_v3 = vsel %vm2836_vm0, %v3608_v1, 0.0 }
 0x3fe   :  { %v3611_v4 = vadd.f32 %v3610_v3, %v3609_v2 }
 0x400   :  { %3612 = vadd.xlane.f32.xlu0 %v3611_v4 }
 0x48d   :  { %v3613_v6 = vpop.xlane.xlu0 %3612 }
 0x48e   :  { %v3615_v61 = vadd.f32 %v3614_v5, %v3613_v6 }
 0x490   :  { %3617 = vst.msk [vmem:[%s5247_s10] sm:$0x3] %vm3616_vm2, %v3615_v61 }
 0x491   :  { %3622 = vsyncpa [#allocation4], 1 }
 0x492   :  { %3623 = vsyncpa [#allocation6], 1 }
 0x493   :  { %3624 = vsyncpa [#allocation9], 1 }
 0x494   :  { %3625 = vsyncpa [#allocation12], 1 }
 0x495   :  { %3626 = vsyncpa [#allocation15], 1 }

</bundles_post_ra>
